<compile_context>
chip_gen: v7x
topology: tpu7x:2x2x1
jax: 0.10.0
libtpu: 0.0.40
codegen_flags: <defaults>
</compile_context>

<pallas_src>
import functools

import jax
import jax.numpy as jnp
import numpy as np
from jax import lax
from jax.experimental import pallas as pl
from jax.experimental.pallas import tpu as pltpu

NUM_EMBEDDINGS = 64
EMBEDDING_DIM = 32
DECAY = 0.99
EPSILON = 1e-5

_ACC_ROWS = 8  # sublane padding for the tiny per-core accumulator outputs


# --------------------------------------------------------------------------- #
# Phase 1: packed argmin codes + per-core counts / dw / sum|x|^2 accumulation.
# --------------------------------------------------------------------------- #
def _phase1_kernel(nvalid_j, tiles_per_core, pack, K,
                   x_ref, ebd_ref, hesq_ref, colwg_ref, ggrp_ref,
                   idx_ref, counts_ref, dw_ref, xsq_ref):
    c = pl.program_id(0)          # core-split axis ("parallel")
    t = pl.program_id(1)          # tile axis        ("arbitrary")
    tile = c * tiles_per_core + t
    tm_p = x_ref.shape[0]

    @pl.when(t == 0)
    def _init():
        counts_ref[...] = jnp.zeros_like(counts_ref)
        dw_ref[...] = jnp.zeros_like(dw_ref)
        xsq_ref[...] = jnp.zeros_like(xsq_ref)

    x = x_ref[...]                                            # [tm_p, pack*D]
    # Packed distances:  xe[r, j*K+k] = <x_row(pack*r+j), e_k>
    # argmin_k |x-e_k|^2 == argmin_k (0.5|e_k|^2 - x.e_k)   (x^2 dropped)
    xe = jnp.dot(x.astype(ebd_ref.dtype), ebd_ref[...],
                 preferred_element_type=jnp.float32)          # [tm_p, pack*K]
    d = hesq_ref[...] - xe

    colwg = colwg_ref[...]                                    # [1, pack*K] (k in group)
    ggrp = ggrp_ref[...]                                      # [1, pack*K] (group id)
    col = colwg[:, 0:K]                                       # [1, K]
    prow = tile * tm_p + lax.broadcasted_iota(jnp.int32, (tm_p, 1), 0)
    gsel = lax.broadcasted_iota(jnp.int32, (1, pack), 1)      # [1, pack]

    enc = jnp.zeros_like(d)                                   # [tm_p, pack*K]
    idx4 = jnp.zeros((tm_p, pack), jnp.int32)
    for j in range(pack):
        dj = d[:, j * K:(j + 1) * K]                          # [tm_p, K]
        mj = jnp.min(dj, axis=1, keepdims=True)
        # First-occurrence argmin (matches torch.argmin tie-breaking).
        ij = jnp.min(jnp.where(dj == mj, col, K), axis=1, keepdims=True)
        ej = ((colwg == ij) & (ggrp == j)).astype(jnp.float32)
        if nvalid_j is not None:  # mask padded rows out of the statistics
            ej = jnp.where(prow < nvalid_j[j], ej, 0.0)
        enc = enc + ej
        idx4 = idx4 + jnp.where(gsel == j, ij, 0)

    idx_ref[...] = idx4                                       # [tm_p, pack]
    counts_ref[...] += jnp.sum(enc, axis=0, keepdims=True)    # bcast to 8 rows
    dw_ref[...] += lax.dot_general(enc, x, (((0,), (0,)), ((), ())),
                                   preferred_element_type=jnp.float32)
    xsq_ref[...] += jnp.sum(x * x, axis=0, keepdims=True)     # for analytic loss


# --------------------------------------------------------------------------- #
# Phase 2: quantize with the UPDATED codebook (packed, lane-dense store).
# --------------------------------------------------------------------------- #
def _phase2_kernel(pack, K, idx_ref, estk_ref, colwg_ref, ggrp_ref, quant_ref):
    colwg = colwg_ref[...]
    ggrp = ggrp_ref[...]
    idx = idx_ref[...]                                        # [tm_p, pack] i32
    tm_p = idx.shape[0]

    enc = jnp.zeros((tm_p, colwg.shape[1]), jnp.float32)      # [tm_p, pack*K]
    for j in range(pack):
        ij = idx[:, j:j + 1]                                  # [tm_p, 1]
        enc = enc + ((colwg == ij) & (ggrp == j)).astype(jnp.float32)

    quant_ref[...] = jnp.dot(enc, estk_ref[...],
                             preferred_element_type=jnp.float32
                             ).astype(quant_ref.dtype)        # [tm_p, pack*D]


def _vmem_limit_bytes(tm_p, pack, K, lanes):
    itemsize = 4
    # Lane-padding aware: the [tm_p, pack] idx block occupies 128 lanes in VMEM.
    per_tile = tm_p * itemsize * (
        2 * lanes          # x / quant block, double-buffered
        + 2 * lanes        # idx block (lane-padded to 128), double-buffered
        + 5 * pack * K)    # xe / d / enc + temporaries
    fixed = itemsize * (4 * pack * K * lanes   # ebd / estk / dw blocks (dbl-buffered)
                        + 16 * pack * K + 16 * lanes)
    return int(min(max(per_tile + fixed + (2 << 20), 16 << 20), 32 << 20))


# --------------------------------------------------------------------------- #
# Wrapper: exact VectorQuantizerEMA1 forward semantics (training=True).
# --------------------------------------------------------------------------- #
def vq_ema_forward(inputs, emb_w, ema_w, ema_cluster_size, *,
                   decay=DECAY, epsilon=EPSILON, tile_rows=4096,
                   core_splits=2, distance_dtype=None, return_encodings=True):
    """inputs: [..., embedding_dim].

    Returns ((quantized, encodings, commitment_loss, perplexity), new_state)
    where new_state holds the updated EMA buffers / embedding weight.
    If return_encodings=False the int32 code indices are returned instead of
    the dense one-hot (avoids the N*K HBM write).
    """
    input_shape = inputs.shape
    K, D = emb_w.shape
    flat = inputs.reshape(-1, D).astype(jnp.float32)
    N = flat.shape[0]

    # 4 rows per 128-lane packed row (pack=4 for D=32).
    pack = 128 // D if (D <= 128 and 128 % D == 0) else 1
    lanes = pack * D

    np_rows = -(-N // pack)                                   # packed rows needed
    tm_p = max(8, min(max(8, (tile_rows // pack) // 8 * 8),
                      -(-np_rows // 8) * 8))
    nc = max(1, int(core_splits))
    tiles_total = -(-np_rows // tm_p)
    tiles_per_core = -(-tiles_total // nc)
    num_tiles = nc * tiles_per_core
    np_pad = num_tiles * tm_p
    n_pad = np_pad * pack

    if n_pad != N:
        flat_p = jnp.pad(flat, ((0, n_pad - N), (0, 0)))
        nvalid_j = tuple((N - j + pack - 1) // pack for j in range(pack))
    else:
        flat_p = flat
        nvalid_j = None
    x_packed = flat_p.reshape(np_pad, lanes)                  # lane-dense x

    emb_w = emb_w.astype(jnp.float32)
    eye = jnp.eye(pack, dtype=jnp.float32)
    ebd = jnp.kron(eye, emb_w.T)                              # [pack*D, pack*K]
    if distance_dtype is not None:
        ebd = ebd.astype(distance_dtype)
    hesq = jnp.tile(0.5 * jnp.sum(emb_w * emb_w, axis=1)[None, :], (1, pack))
    colwg = jnp.tile(jnp.arange(K, dtype=jnp.int32)[None, :], (1, pack))
    ggrp = jnp.repeat(jnp.arange(pack, dtype=jnp.int32), K)[None, :]

    vmem_bytes = _vmem_limit_bytes(tm_p, pack, K, lanes)

    # ------------- phase 1: codes + per-core counts / dw / sum|x|^2 ----------
    idx_p, counts_acc, dw_acc, xsq_acc = pl.pallas_call(
        functools.partial(_phase1_kernel, nvalid_j, tiles_per_core, pack, K),
        grid=(nc, tiles_per_core),
        in_specs=[
            pl.BlockSpec((tm_p, lanes), lambda c, t: (c * tiles_per_core + t, 0)),
            pl.BlockSpec((lanes, pack * K), lambda c, t: (0, 0)),
            pl.BlockSpec((1, pack * K), lambda c, t: (0, 0)),
            pl.BlockSpec((1, pack * K), lambda c, t: (0, 0)),
            pl.BlockSpec((1, pack * K), lambda c, t: (0, 0)),
        ],
        out_specs=(
            pl.BlockSpec((tm_p, pack), lambda c, t: (c * tiles_per_core + t, 0)),
            pl.BlockSpec((_ACC_ROWS, pack * K), lambda c, t: (c, 0)),
            pl.BlockSpec((pack * K, lanes), lambda c, t: (c, 0)),
            pl.BlockSpec((_ACC_ROWS, lanes), lambda c, t: (c, 0)),
        ),
        out_shape=(
            jax.ShapeDtypeStruct((np_pad, pack), jnp.int32),            # codes
            jax.ShapeDtypeStruct((nc * _ACC_ROWS, pack * K), jnp.float32),
            jax.ShapeDtypeStruct((nc * pack * K, lanes), jnp.float32),  # dw partials
            jax.ShapeDtypeStruct((nc * _ACC_ROWS, lanes), jnp.float32), # sum|x|^2
        ),
        compiler_params=pltpu.CompilerParams(
            dimension_semantics=("parallel", "arbitrary"),
            vmem_limit_bytes=vmem_bytes),
        cost_estimate=pl.CostEstimate(
            flops=4 * np_pad * pack * K * lanes + 12 * np_pad * pack * K,
            transcendentals=0,
            bytes_accessed=np_pad * (lanes + pack) * 4
                           + 4 * nc * pack * K * lanes),
    )(x_packed, ebd, hesq, colwg, ggrp)

    # Fold per-core / per-group partials (tiny, plain JAX).
    counts256 = counts_acc.reshape(nc, _ACC_ROWS, pack * K)[:, 0, :].sum(axis=0)
    counts = counts256.reshape(pack, K).sum(axis=0)                       # [K]
    dw_full = dw_acc.reshape(nc, pack * K, lanes).sum(axis=0)             # [pack*K, pack*D]
    dw = sum(dw_full[j * K:(j + 1) * K, j * D:(j + 1) * D] for j in range(pack))
    xsq = jnp.sum(xsq_acc.reshape(nc, _ACC_ROWS, lanes)[:, 0, :])

    # ------------- tiny EMA update (exact PyTorch op order) ------------------
    cluster = ema_cluster_size.astype(jnp.float32) * decay + (1.0 - decay) * counts
    n_total = jnp.sum(cluster)
    cluster = (cluster + epsilon) / (n_total + K * epsilon) * n_total
    ema_w_new = ema_w.astype(jnp.float32) * decay + (1.0 - decay) * dw
    emb_new = ema_w_new / cluster[:, None]          # updated embedding.weight

    # ------------- phase 2: quantize with the updated codebook ---------------
    estk = jnp.kron(eye, emb_new)                                         # [pack*K, pack*D]
    quant_p = pl.pallas_call(
        functools.partial(_phase2_kernel, pack, K),
        grid=(num_tiles,),
        in_specs=[
            pl.BlockSpec((tm_p, pack), lambda i: (i, 0)),
            pl.BlockSpec((pack * K, lanes), lambda i: (0, 0)),
            pl.BlockSpec((1, pack * K), lambda i: (0, 0)),
            pl.BlockSpec((1, pack * K), lambda i: (0, 0)),
        ],
        out_specs=pl.BlockSpec((tm_p, lanes), lambda i: (i, 0)),
        out_shape=jax.ShapeDtypeStruct((np_pad, lanes), jnp.float32),
        compiler_params=pltpu.CompilerParams(
            dimension_semantics=("parallel",),
            vmem_limit_bytes=vmem_bytes),
        cost_estimate=pl.CostEstimate(
            flops=2 * np_pad * pack * K * lanes,
            transcendentals=0,
            bytes_accessed=np_pad * (lanes + pack) * 4 + pack * K * lanes * 4),
    )(idx_p, estk, colwg, ggrp)

    quantized = quant_p.reshape(-1, D)[:N].reshape(input_shape)  # ST fwd value

    # Analytic commitment loss from phase-1 stats (no x read in phase 2).
    cross = jnp.sum(dw * emb_new)
    enorm = jnp.sum(counts * jnp.sum(emb_new * emb_new, axis=1))
    commitment_loss = (xsq - 2.0 * cross + enorm) / (N * D)

    codes = idx_p.reshape(-1)[:N]
    encodings = (jax.nn.one_hot(codes, K, dtype=jnp.float32)
                 if return_encodings else codes)
    avg_probs = counts / N
    perplexity = jnp.exp(-jnp.sum(avg_probs * jnp.log(avg_probs + 1e-10)))

    new_state = {"embedding_weight": emb_new,
                 "ema_w": ema_w_new,
                 "ema_cluster_size": cluster}
    return (quantized, encodings, commitment_loss, perplexity), new_state


# --------------------------------------------------------------------------- #
# Pure-JAX reference (mirrors the PyTorch module, training=True).
# --------------------------------------------------------------------------- #
def _reference(inputs, emb_w, ema_w, cluster, decay=DECAY, epsilon=EPSILON):
    K, D = emb_w.shape
    shp = inputs.shape
    flat = inputs.reshape(-1, D)
    dist = (jnp.sum(flat ** 2, axis=1, keepdims=True)
            + jnp.sum(emb_w ** 2, axis=1)[None, :]
            - 2.0 * flat @ emb_w.T)
    idx = jnp.argmin(dist, axis=1)
    enc = jax.nn.one_hot(idx, K, dtype=jnp.float32)
    cluster = cluster * decay + (1 - decay) * jnp.sum(enc, axis=0)
    n = jnp.sum(cluster)
    cluster = (cluster + epsilon) / (n + K * epsilon) * n
    dw = enc.T @ flat
    ema_w = ema_w * decay + (1 - decay) * dw
    emb_new = ema_w / cluster[:, None]
    quant = (enc @ emb_new).reshape(shp)
    loss = jnp.mean((quant - inputs) ** 2)
    avg = jnp.mean(enc, axis=0)
    perp = jnp.exp(-jnp.sum(avg * jnp.log(avg + 1e-10)))
    return quant, enc, loss, perp


if __name__ == "__main__":
    key = jax.random.PRNGKey(0)
    k_in, k_emb, k_ema = jax.random.split(key, 3)

    B, H, W = 2, 16, 16          # NHWC, C == embedding_dim; N = 512 rows
    inputs = jax.random.normal(k_in, (B, H, W, EMBEDDING_DIM), dtype=jnp.float32)
    emb_w = jax.random.normal(k_emb, (NUM_EMBEDDINGS, EMBEDDING_DIM), dtype=jnp.float32)
    ema_w = jax.random.normal(k_ema, (NUM_EMBEDDINGS, EMBEDDING_DIM), dtype=jnp.float32)
    ema_cluster_size = jnp.zeros((NUM_EMBEDDINGS,), dtype=jnp.float32)

    # Small tile only to exercise multi-tile pipelining, the 2-way core split
    # and the padded-row masking at this toy size (production default is 4096).
    outs, new_state = vq_ema_forward(inputs, emb_w, ema_w, ema_cluster_size,
                                     tile_rows=96, core_splits=2)
    jax.block_until_ready(outs)

    quantized, encodings, commitment_loss, perplexity = outs
    assert quantized.shape == inputs.shape
    assert encodings.shape == (B * H * W, NUM_EMBEDDINGS)

    r_q, r_e, r_l, r_p = _reference(inputs, emb_w, ema_w, ema_cluster_size)
    np.testing.assert_allclose(np.asarray(quantized), np.asarray(r_q),
                               rtol=2e-3, atol=2e-3)
    np.testing.assert_allclose(np.asarray(encodings), np.asarray(r_e), atol=1e-6)
    np.testing.assert_allclose(float(commitment_loss), float(r_l),
                               rtol=2e-3, atol=2e-5)
    np.testing.assert_allclose(float(perplexity), float(r_p),
                               rtol=2e-3, atol=2e-3)

    print("KERNEL_OK")
</pallas_src>

<mosaic_0001>
module attributes {stable_mosaic.version = 11 : i64} {
  func.func @_phase1_kernel(%arg0: i32, %arg1: i32, %arg2: memref<24x128xf32, #tpu.memory_space<vmem>>, %arg3: memref<128x256xf32, #tpu.memory_space<vmem>>, %arg4: memref<1x256xf32, #tpu.memory_space<vmem>>, %arg5: memref<1x256xi32, #tpu.memory_space<vmem>>, %arg6: memref<1x256xi32, #tpu.memory_space<vmem>>, %arg7: memref<24x4xi32, #tpu.memory_space<vmem>>, %arg8: memref<8x256xf32, #tpu.memory_space<vmem>>, %arg9: memref<256x128xf32, #tpu.memory_space<vmem>>, %arg10: memref<8x128xf32, #tpu.memory_space<vmem>>) attributes {dimension_semantics = [#tpu.dimension_semantics<parallel>, #tpu.dimension_semantics<arbitrary>], iteration_bounds = array<i64: 2, 3>, scalar_prefetch = 0 : i64, scratch_operands = 0 : i64, tpu.core_type = #tpu.core_type<tc>, window_params = [{transform_indices = @transform_0, window_bounds = array<i64: 24, 128>}, {pipeline_mode = #tpu.pipeline_mode<synchronous>, transform_indices = @transform_1, window_bounds = array<i64: 128, 256>}, {pipeline_mode = #tpu.pipeline_mode<synchronous>, transform_indices = @transform_2, window_bounds = array<i64: 1, 256>}, {pipeline_mode = #tpu.pipeline_mode<synchronous>, transform_indices = @transform_3, window_bounds = array<i64: 1, 256>}, {pipeline_mode = #tpu.pipeline_mode<synchronous>, transform_indices = @transform_4, window_bounds = array<i64: 1, 256>}, {transform_indices = @transform_5, window_bounds = array<i64: 24, 4>}, {transform_indices = @transform_6, window_bounds = array<i64: 8, 256>}, {transform_indices = @transform_7, window_bounds = array<i64: 256, 128>}, {transform_indices = @transform_8, window_bounds = array<i64: 8, 128>}]} {
    %c3_i32 = arith.constant 3 : i32
    %0 = arith.muli %arg0, %c3_i32 : i32
    %1 = arith.addi %0, %arg1 : i32
    %c0_i32 = arith.constant 0 : i32
    %2 = arith.cmpi eq, %arg1, %c0_i32 : i32
    %3 = arith.extui %2 : i1 to i32
    %c0_i32_0 = arith.constant 0 : i32
    %4 = arith.cmpi ne, %3, %c0_i32_0 : i32
    scf.if %4 {
      %cst_57 = arith.constant 0.000000e+00 : f32
      %183 = vector.broadcast %cst_57 : f32 to vector<8x256xf32>
      %c0_58 = arith.constant 0 : index
      %c0_59 = arith.constant 0 : index
      %184 = vector.load %arg8[%c0_58, %c0_59] : memref<8x256xf32, #tpu.memory_space<vmem>>, vector<8x256xf32>
      tpu.vector_store %arg8[%c0_58, %c0_59], %183 {strides = array<i32>} : memref<8x256xf32, #tpu.memory_space<vmem>>, vector<8x256xf32>,
      %cst_60 = arith.constant 0.000000e+00 : f32
      %185 = vector.broadcast %cst_60 : f32 to vector<256x128xf32>
      %c0_61 = arith.constant 0 : index
      %c0_62 = arith.constant 0 : index
      %186 = vector.load %arg9[%c0_61, %c0_62] : memref<256x128xf32, #tpu.memory_space<vmem>>, vector<256x128xf32>
      tpu.vector_store %arg9[%c0_61, %c0_62], %185 {strides = array<i32>} : memref<256x128xf32, #tpu.memory_space<vmem>>, vector<256x128xf32>,
      %cst_63 = arith.constant 0.000000e+00 : f32
      %187 = vector.broadcast %cst_63 : f32 to vector<8x128xf32>
      %c0_64 = arith.constant 0 : index
      %c0_65 = arith.constant 0 : index
      %188 = vector.load %arg10[%c0_64, %c0_65] : memref<8x128xf32, #tpu.memory_space<vmem>>, vector<8x128xf32>
      tpu.vector_store %arg10[%c0_64, %c0_65], %187 {strides = array<i32>} : memref<8x128xf32, #tpu.memory_space<vmem>>, vector<8x128xf32>,
    } else {
    }
    %c0 = arith.constant 0 : index
    %c0_1 = arith.constant 0 : index
    %5 = vector.load %arg2[%c0, %c0_1] : memref<24x128xf32, #tpu.memory_space<vmem>>, vector<24x128xf32>
    %c0_2 = arith.constant 0 : index
    %c0_3 = arith.constant 0 : index
    %6 = vector.load %arg3[%c0_2, %c0_3] : memref<128x256xf32, #tpu.memory_space<vmem>>, vector<128x256xf32>
    %cst = arith.constant dense<0.000000e+00> : vector<24x256xf32>
    %7 = tpu.matmul %5, %6, %cst {dimension_numbers = #tpu.dot_dimension_numbers<[1], [0], [0], [1], [0, 0, 1, 1], [], []>} : vector<24x128xf32>, vector<128x256xf32>, vector<24x256xf32> -> vector<24x256xf32>
    %c0_4 = arith.constant 0 : index
    %c0_5 = arith.constant 0 : index
    %8 = vector.load %arg4[%c0_4, %c0_5] : memref<1x256xf32, #tpu.memory_space<vmem>>, vector<1x256xf32>
    %9 = vector.broadcast %8 : vector<1x256xf32> to vector<24x256xf32>
    %10 = arith.subf %9, %7 : vector<24x256xf32>
    %c0_6 = arith.constant 0 : index
    %c0_7 = arith.constant 0 : index
    %11 = vector.load %arg5[%c0_6, %c0_7] : memref<1x256xi32, #tpu.memory_space<vmem>>, vector<1x256xi32>
    %c0_8 = arith.constant 0 : index
    %c0_9 = arith.constant 0 : index
    %12 = vector.load %arg6[%c0_8, %c0_9] : memref<1x256xi32, #tpu.memory_space<vmem>>, vector<1x256xi32>
    %13 = vector.extract_strided_slice %11 {offsets = [0, 0], sizes = [1, 64], strides = [1, 1]} : vector<1x256xi32> to vector<1x64xi32>
    %c24_i32 = arith.constant 24 : i32
    %14 = arith.muli %1, %c24_i32 : i32
    %15 = tpu.iota {dimensions = array<i32: 0>} : vector<24x1xi32>
    %16 = vector.broadcast %14 : i32 to vector<24x1xi32>
    %17 = arith.addi %16, %15 : vector<24x1xi32>
    %18 = tpu.iota {dimensions = array<i32: 1>} : vector<1x4xi32>
    %cst_10 = arith.constant 0.000000e+00 : f32
    %19 = vector.broadcast %cst_10 : f32 to vector<24x256xf32>
    %c0_i32_11 = arith.constant 0 : i32
    %20 = vector.broadcast %c0_i32_11 : i32 to vector<24x4xi32>
    %21 = vector.extract_strided_slice %10 {offsets = [0, 0], sizes = [24, 64], strides = [1, 1]} : vector<24x256xf32> to vector<24x64xf32>
    %cst_12 = arith.constant dense<0x7F800000> : vector<24xf32>
    %22 = vector.multi_reduction <minimumf>, %21, %cst_12 [1] : vector<24x64xf32> to vector<24xf32>
    %23 = vector.shape_cast %22 : vector<24xf32> to vector<24x1xf32>
    %24 = vector.broadcast %23 : vector<24x1xf32> to vector<24x64xf32>
    %25 = arith.cmpf oeq, %21, %24 : vector<24x64xf32>
    %c64_i32 = arith.constant 64 : i32
    %26 = vector.shape_cast %13 : vector<1x64xi32> to vector<1x64xi32>
    %27 = vector.broadcast %26 : vector<1x64xi32> to vector<24x64xi32>
    %28 = vector.broadcast %c64_i32 : i32 to vector<24x64xi32>
    %29 = arith.select %25, %27, %28 : vector<24x64xi1>, vector<24x64xi32>
    %cst_13 = arith.constant dense<2147483647> : vector<24xi32>
    %30 = vector.multi_reduction <minsi>, %29, %cst_13 [1] : vector<24x64xi32> to vector<24xi32>
    %31 = vector.shape_cast %30 : vector<24xi32> to vector<24x1xi32>
    %32 = vector.broadcast %11 : vector<1x256xi32> to vector<24x256xi32>
    %33 = vector.broadcast %31 : vector<24x1xi32> to vector<24x256xi32>
    %34 = arith.cmpi eq, %32, %33 : vector<24x256xi32>
    %c0_i32_14 = arith.constant 0 : i32
    %35 = vector.broadcast %c0_i32_14 : i32 to vector<1x256xi32>
    %36 = arith.cmpi eq, %12, %35 : vector<1x256xi32>
    %37 = vector.broadcast %36 : vector<1x256xi1> to vector<24x256xi1>
    %38 = arith.andi %34, %37 : vector<24x256xi1>
    %39 = arith.extui %38 : vector<24x256xi1> to vector<24x256xi32>
    %40 = arith.sitofp %39 : vector<24x256xi32> to vector<24x256xf32>
    %c128_i32 = arith.constant 128 : i32
    %41 = vector.broadcast %c128_i32 : i32 to vector<24x1xi32>
    %42 = arith.cmpi slt, %17, %41 : vector<24x1xi32>
    %cst_15 = arith.constant 0.000000e+00 : f32
    %43 = vector.shape_cast %42 : vector<24x1xi1> to vector<24x1xi1>
    %44 = vector.broadcast %43 : vector<24x1xi1> to vector<24x256xi1>
    %45 = vector.broadcast %cst_15 : f32 to vector<24x256xf32>
    %46 = arith.select %44, %40, %45 : vector<24x256xi1>, vector<24x256xf32>
    %47 = arith.addf %19, %46 : vector<24x256xf32>
    %c0_i32_16 = arith.constant 0 : i32
    %48 = vector.broadcast %c0_i32_16 : i32 to vector<1x4xi32>
    %49 = arith.cmpi eq, %18, %48 : vector<1x4xi32>
    %c0_i32_17 = arith.constant 0 : i32
    %50 = vector.shape_cast %49 : vector<1x4xi1> to vector<1x4xi1>
    %51 = vector.broadcast %50 : vector<1x4xi1> to vector<24x4xi1>
    %52 = vector.shape_cast %31 : vector<24x1xi32> to vector<24x1xi32>
    %53 = vector.broadcast %52 : vector<24x1xi32> to vector<24x4xi32>
    %54 = vector.broadcast %c0_i32_17 : i32 to vector<24x4xi32>
    %55 = arith.select %51, %53, %54 : vector<24x4xi1>, vector<24x4xi32>
    %56 = arith.addi %20, %55 : vector<24x4xi32>
    %57 = vector.extract_strided_slice %10 {offsets = [0, 64], sizes = [24, 64], strides = [1, 1]} : vector<24x256xf32> to vector<24x64xf32>
    %cst_18 = arith.constant dense<0x7F800000> : vector<24xf32>
    %58 = vector.multi_reduction <minimumf>, %57, %cst_18 [1] : vector<24x64xf32> to vector<24xf32>
    %59 = vector.shape_cast %58 : vector<24xf32> to vector<24x1xf32>
    %60 = vector.broadcast %59 : vector<24x1xf32> to vector<24x64xf32>
    %61 = arith.cmpf oeq, %57, %60 : vector<24x64xf32>
    %c64_i32_19 = arith.constant 64 : i32
    %62 = vector.shape_cast %13 : vector<1x64xi32> to vector<1x64xi32>
    %63 = vector.broadcast %62 : vector<1x64xi32> to vector<24x64xi32>
    %64 = vector.broadcast %c64_i32_19 : i32 to vector<24x64xi32>
    %65 = arith.select %61, %63, %64 : vector<24x64xi1>, vector<24x64xi32>
    %cst_20 = arith.constant dense<2147483647> : vector<24xi32>
    %66 = vector.multi_reduction <minsi>, %65, %cst_20 [1] : vector<24x64xi32> to vector<24xi32>
    %67 = vector.shape_cast %66 : vector<24xi32> to vector<24x1xi32>
    %68 = vector.broadcast %11 : vector<1x256xi32> to vector<24x256xi32>
    %69 = vector.broadcast %67 : vector<24x1xi32> to vector<24x256xi32>
    %70 = arith.cmpi eq, %68, %69 : vector<24x256xi32>
    %c1_i32 = arith.constant 1 : i32
    %71 = vector.broadcast %c1_i32 : i32 to vector<1x256xi32>
    %72 = arith.cmpi eq, %12, %71 : vector<1x256xi32>
    %73 = vector.broadcast %72 : vector<1x256xi1> to vector<24x256xi1>
    %74 = arith.andi %70, %73 : vector<24x256xi1>
    %75 = arith.extui %74 : vector<24x256xi1> to vector<24x256xi32>
    %76 = arith.sitofp %75 : vector<24x256xi32> to vector<24x256xf32>
    %c128_i32_21 = arith.constant 128 : i32
    %77 = vector.broadcast %c128_i32_21 : i32 to vector<24x1xi32>
    %78 = arith.cmpi slt, %17, %77 : vector<24x1xi32>
    %cst_22 = arith.constant 0.000000e+00 : f32
    %79 = vector.shape_cast %78 : vector<24x1xi1> to vector<24x1xi1>
    %80 = vector.broadcast %79 : vector<24x1xi1> to vector<24x256xi1>
    %81 = vector.broadcast %cst_22 : f32 to vector<24x256xf32>
    %82 = arith.select %80, %76, %81 : vector<24x256xi1>, vector<24x256xf32>
    %83 = arith.addf %47, %82 : vector<24x256xf32>
    %c1_i32_23 = arith.constant 1 : i32
    %84 = vector.broadcast %c1_i32_23 : i32 to vector<1x4xi32>
    %85 = arith.cmpi eq, %18, %84 : vector<1x4xi32>
    %c0_i32_24 = arith.constant 0 : i32
    %86 = vector.shape_cast %85 : vector<1x4xi1> to vector<1x4xi1>
    %87 = vector.broadcast %86 : vector<1x4xi1> to vector<24x4xi1>
    %88 = vector.shape_cast %67 : vector<24x1xi32> to vector<24x1xi32>
    %89 = vector.broadcast %88 : vector<24x1xi32> to vector<24x4xi32>
    %90 = vector.broadcast %c0_i32_24 : i32 to vector<24x4xi32>
    %91 = arith.select %87, %89, %90 : vector<24x4xi1>, vector<24x4xi32>
    %92 = arith.addi %56, %91 : vector<24x4xi32>
    %93 = vector.extract_strided_slice %10 {offsets = [0, 128], sizes = [24, 64], strides = [1, 1]} : vector<24x256xf32> to vector<24x64xf32>
    %cst_25 = arith.constant dense<0x7F800000> : vector<24xf32>
    %94 = vector.multi_reduction <minimumf>, %93, %cst_25 [1] : vector<24x64xf32> to vector<24xf32>
    %95 = vector.shape_cast %94 : vector<24xf32> to vector<24x1xf32>
    %96 = vector.broadcast %95 : vector<24x1xf32> to vector<24x64xf32>
    %97 = arith.cmpf oeq, %93, %96 : vector<24x64xf32>
    %c64_i32_26 = arith.constant 64 : i32
    %98 = vector.shape_cast %13 : vector<1x64xi32> to vector<1x64xi32>
    %99 = vector.broadcast %98 : vector<1x64xi32> to vector<24x64xi32>
    %100 = vector.broadcast %c64_i32_26 : i32 to vector<24x64xi32>
    %101 = arith.select %97, %99, %100 : vector<24x64xi1>, vector<24x64xi32>
    %cst_27 = arith.constant dense<2147483647> : vector<24xi32>
    %102 = vector.multi_reduction <minsi>, %101, %cst_27 [1] : vector<24x64xi32> to vector<24xi32>
    %103 = vector.shape_cast %102 : vector<24xi32> to vector<24x1xi32>
    %104 = vector.broadcast %11 : vector<1x256xi32> to vector<24x256xi32>
    %105 = vector.broadcast %103 : vector<24x1xi32> to vector<24x256xi32>
    %106 = arith.cmpi eq, %104, %105 : vector<24x256xi32>
    %c2_i32 = arith.constant 2 : i32
    %107 = vector.broadcast %c2_i32 : i32 to vector<1x256xi32>
    %108 = arith.cmpi eq, %12, %107 : vector<1x256xi32>
    %109 = vector.broadcast %108 : vector<1x256xi1> to vector<24x256xi1>
    %110 = arith.andi %106, %109 : vector<24x256xi1>
    %111 = arith.extui %110 : vector<24x256xi1> to vector<24x256xi32>
    %112 = arith.sitofp %111 : vector<24x256xi32> to vector<24x256xf32>
    %c128_i32_28 = arith.constant 128 : i32
    %113 = vector.broadcast %c128_i32_28 : i32 to vector<24x1xi32>
    %114 = arith.cmpi slt, %17, %113 : vector<24x1xi32>
    %cst_29 = arith.constant 0.000000e+00 : f32
    %115 = vector.shape_cast %114 : vector<24x1xi1> to vector<24x1xi1>
    %116 = vector.broadcast %115 : vector<24x1xi1> to vector<24x256xi1>
    %117 = vector.broadcast %cst_29 : f32 to vector<24x256xf32>
    %118 = arith.select %116, %112, %117 : vector<24x256xi1>, vector<24x256xf32>
    %119 = arith.addf %83, %118 : vector<24x256xf32>
    %c2_i32_30 = arith.constant 2 : i32
    %120 = vector.broadcast %c2_i32_30 : i32 to vector<1x4xi32>
    %121 = arith.cmpi eq, %18, %120 : vector<1x4xi32>
    %c0_i32_31 = arith.constant 0 : i32
    %122 = vector.shape_cast %121 : vector<1x4xi1> to vector<1x4xi1>
    %123 = vector.broadcast %122 : vector<1x4xi1> to vector<24x4xi1>
    %124 = vector.shape_cast %103 : vector<24x1xi32> to vector<24x1xi32>
    %125 = vector.broadcast %124 : vector<24x1xi32> to vector<24x4xi32>
    %126 = vector.broadcast %c0_i32_31 : i32 to vector<24x4xi32>
    %127 = arith.select %123, %125, %126 : vector<24x4xi1>, vector<24x4xi32>
    %128 = arith.addi %92, %127 : vector<24x4xi32>
    %129 = vector.extract_strided_slice %10 {offsets = [0, 192], sizes = [24, 64], strides = [1, 1]} : vector<24x256xf32> to vector<24x64xf32>
    %cst_32 = arith.constant dense<0x7F800000> : vector<24xf32>
    %130 = vector.multi_reduction <minimumf>, %129, %cst_32 [1] : vector<24x64xf32> to vector<24xf32>
    %131 = vector.shape_cast %130 : vector<24xf32> to vector<24x1xf32>
    %132 = vector.broadcast %131 : vector<24x1xf32> to vector<24x64xf32>
    %133 = arith.cmpf oeq, %129, %132 : vector<24x64xf32>
    %c64_i32_33 = arith.constant 64 : i32
    %134 = vector.shape_cast %13 : vector<1x64xi32> to vector<1x64xi32>
    %135 = vector.broadcast %134 : vector<1x64xi32> to vector<24x64xi32>
    %136 = vector.broadcast %c64_i32_33 : i32 to vector<24x64xi32>
    %137 = arith.select %133, %135, %136 : vector<24x64xi1>, vector<24x64xi32>
    %cst_34 = arith.constant dense<2147483647> : vector<24xi32>
    %138 = vector.multi_reduction <minsi>, %137, %cst_34 [1] : vector<24x64xi32> to vector<24xi32>
    %139 = vector.shape_cast %138 : vector<24xi32> to vector<24x1xi32>
    %140 = vector.broadcast %11 : vector<1x256xi32> to vector<24x256xi32>
    %141 = vector.broadcast %139 : vector<24x1xi32> to vector<24x256xi32>
    %142 = arith.cmpi eq, %140, %141 : vector<24x256xi32>
    %c3_i32_35 = arith.constant 3 : i32
    %143 = vector.broadcast %c3_i32_35 : i32 to vector<1x256xi32>
    %144 = arith.cmpi eq, %12, %143 : vector<1x256xi32>
    %145 = vector.broadcast %144 : vector<1x256xi1> to vector<24x256xi1>
    %146 = arith.andi %142, %145 : vector<24x256xi1>
    %147 = arith.extui %146 : vector<24x256xi1> to vector<24x256xi32>
    %148 = arith.sitofp %147 : vector<24x256xi32> to vector<24x256xf32>
    %c128_i32_36 = arith.constant 128 : i32
    %149 = vector.broadcast %c128_i32_36 : i32 to vector<24x1xi32>
    %150 = arith.cmpi slt, %17, %149 : vector<24x1xi32>
    %cst_37 = arith.constant 0.000000e+00 : f32
    %151 = vector.shape_cast %150 : vector<24x1xi1> to vector<24x1xi1>
    %152 = vector.broadcast %151 : vector<24x1xi1> to vector<24x256xi1>
    %153 = vector.broadcast %cst_37 : f32 to vector<24x256xf32>
    %154 = arith.select %152, %148, %153 : vector<24x256xi1>, vector<24x256xf32>
    %155 = arith.addf %119, %154 : vector<24x256xf32>
    %c3_i32_38 = arith.constant 3 : i32
    %156 = vector.broadcast %c3_i32_38 : i32 to vector<1x4xi32>
    %157 = arith.cmpi eq, %18, %156 : vector<1x4xi32>
    %c0_i32_39 = arith.constant 0 : i32
    %158 = vector.shape_cast %157 : vector<1x4xi1> to vector<1x4xi1>
    %159 = vector.broadcast %158 : vector<1x4xi1> to vector<24x4xi1>
    %160 = vector.shape_cast %139 : vector<24x1xi32> to vector<24x1xi32>
    %161 = vector.broadcast %160 : vector<24x1xi32> to vector<24x4xi32>
    %162 = vector.broadcast %c0_i32_39 : i32 to vector<24x4xi32>
    %163 = arith.select %159, %161, %162 : vector<24x4xi1>, vector<24x4xi32>
    %164 = arith.addi %128, %163 : vector<24x4xi32>
    %c0_40 = arith.constant 0 : index
    %c0_41 = arith.constant 0 : index
    %165 = vector.load %arg7[%c0_40, %c0_41] : memref<24x4xi32, #tpu.memory_space<vmem>>, vector<24x4xi32>
    tpu.vector_store %arg7[%c0_40, %c0_41], %164 {strides = array<i32>} : memref<24x4xi32, #tpu.memory_space<vmem>>, vector<24x4xi32>,
    %c0_42 = arith.constant 0 : index
    %c0_43 = arith.constant 0 : index
    %166 = vector.load %arg8[%c0_42, %c0_43] : memref<8x256xf32, #tpu.memory_space<vmem>>, vector<8x256xf32>
    %cst_44 = arith.constant dense<0.000000e+00> : vector<256xf32>
    %167 = vector.multi_reduction <add>, %155, %cst_44 [0] : vector<24x256xf32> to vector<256xf32>
    %168 = vector.shape_cast %167 : vector<256xf32> to vector<1x256xf32>
    %169 = vector.broadcast %168 : vector<1x256xf32> to vector<8x256xf32>
    %170 = arith.addf %166, %169 : vector<8x256xf32>
    %c0_45 = arith.constant 0 : index
    %c0_46 = arith.constant 0 : index
    %171 = vector.load %arg8[%c0_45, %c0_46] : memref<8x256xf32, #tpu.memory_space<vmem>>, vector<8x256xf32>
    tpu.vector_store %arg8[%c0_45, %c0_46], %170 {strides = array<i32>} : memref<8x256xf32, #tpu.memory_space<vmem>>, vector<8x256xf32>,
    %c0_47 = arith.constant 0 : index
    %c0_48 = arith.constant 0 : index
    %172 = vector.load %arg9[%c0_47, %c0_48] : memref<256x128xf32, #tpu.memory_space<vmem>>, vector<256x128xf32>
    %cst_49 = arith.constant dense<0.000000e+00> : vector<256x128xf32>
    %173 = tpu.matmul %155, %5, %cst_49 {dimension_numbers = #tpu.dot_dimension_numbers<[0], [0], [1], [1], [0, 1, 1, 1], [], []>} : vector<24x256xf32>, vector<24x128xf32>, vector<256x128xf32> -> vector<256x128xf32>
    %174 = arith.addf %172, %173 : vector<256x128xf32>
    %c0_50 = arith.constant 0 : index
    %c0_51 = arith.constant 0 : index
    %175 = vector.load %arg9[%c0_50, %c0_51] : memref<256x128xf32, #tpu.memory_space<vmem>>, vector<256x128xf32>
    tpu.vector_store %arg9[%c0_50, %c0_51], %174 {strides = array<i32>} : memref<256x128xf32, #tpu.memory_space<vmem>>, vector<256x128xf32>,
    %c0_52 = arith.constant 0 : index
    %c0_53 = arith.constant 0 : index
    %176 = vector.load %arg10[%c0_52, %c0_53] : memref<8x128xf32, #tpu.memory_space<vmem>>, vector<8x128xf32>
    %177 = arith.mulf %5, %5 : vector<24x128xf32>
    %cst_54 = arith.constant dense<0.000000e+00> : vector<128xf32>
    %178 = vector.multi_reduction <add>, %177, %cst_54 [0] : vector<24x128xf32> to vector<128xf32>
    %179 = vector.shape_cast %178 : vector<128xf32> to vector<1x128xf32>
    %180 = vector.broadcast %179 : vector<1x128xf32> to vector<8x128xf32>
    %181 = arith.addf %176, %180 : vector<8x128xf32>
    %c0_55 = arith.constant 0 : index
    %c0_56 = arith.constant 0 : index
    %182 = vector.load %arg10[%c0_55, %c0_56] : memref<8x128xf32, #tpu.memory_space<vmem>>, vector<8x128xf32>
    tpu.vector_store %arg10[%c0_55, %c0_56], %181 {strides = array<i32>} : memref<8x128xf32, #tpu.memory_space<vmem>>, vector<8x128xf32>,
    return
  }
  func.func @transform_0(%arg0: i32, %arg1: i32) -> (i32, i32) {
    %c3_i32 = arith.constant 3 : i32
    %0 = arith.muli %arg0, %c3_i32 : i32
    %1 = arith.addi %0, %arg1 : i32
    %c0_i32 = arith.constant 0 : i32
    %c0_i32_0 = arith.constant 0 : i32
    return %1, %c0_i32 : i32, i32
  }
  func.func @transform_1(%arg0: i32, %arg1: i32) -> (i32, i32) {
    %c0_i32 = arith.constant 0 : i32
    %c0_i32_0 = arith.constant 0 : i32
    %c0_i32_1 = arith.constant 0 : i32
    return %c0_i32, %c0_i32_0 : i32, i32
  }
  func.func @transform_2(%arg0: i32, %arg1: i32) -> (i32, i32) {
    %c0_i32 = arith.constant 0 : i32
    %c0_i32_0 = arith.constant 0 : i32
    %c0_i32_1 = arith.constant 0 : i32
    return %c0_i32, %c0_i32_0 : i32, i32
  }
  func.func @transform_3(%arg0: i32, %arg1: i32) -> (i32, i32) {
    %c0_i32 = arith.constant 0 : i32
    %c0_i32_0 = arith.constant 0 : i32
    %c0_i32_1 = arith.constant 0 : i32
    return %c0_i32, %c0_i32_0 : i32, i32
  }
  func.func @transform_4(%arg0: i32, %arg1: i32) -> (i32, i32) {
    %c0_i32 = arith.constant 0 : i32
    %c0_i32_0 = arith.constant 0 : i32
    %c0_i32_1 = arith.constant 0 : i32
    return %c0_i32, %c0_i32_0 : i32, i32
  }
  func.func @transform_5(%arg0: i32, %arg1: i32) -> (i32, i32) {
    %c3_i32 = arith.constant 3 : i32
    %0 = arith.muli %arg0, %c3_i32 : i32
    %1 = arith.addi %0, %arg1 : i32
    %c0_i32 = arith.constant 0 : i32
    %c0_i32_0 = arith.constant 0 : i32
    return %1, %c0_i32 : i32, i32
  }
  func.func @transform_6(%arg0: i32, %arg1: i32) -> (i32, i32) {
    %c0_i32 = arith.constant 0 : i32
    %c0_i32_0 = arith.constant 0 : i32
    return %arg0, %c0_i32 : i32, i32
  }
  func.func @transform_7(%arg0: i32, %arg1: i32) -> (i32, i32) {
    %c0_i32 = arith.constant 0 : i32
    %c0_i32_0 = arith.constant 0 : i32
    return %arg0, %c0_i32 : i32, i32
  }
  func.func @transform_8(%arg0: i32, %arg1: i32) -> (i32, i32) {
    %c0_i32 = arith.constant 0 : i32
    %c0_i32_0 = arith.constant 0 : i32
    return %arg0, %c0_i32 : i32, i32
  }
}

</mosaic_0001>

<bundles_post_ra>
// kernel: tpu_custom_call.1
= control target key start
LH: loop header
LB: loop body
LE: loop exit
PB: predicated region body
PF: predicated region fallthrough
CT: control target
= control target key end

     0   :  { %s3526_s0 = inlined_call_operand.hbm [shape: f32[144,128], index: 0, kind: input, shape index: {}]   ;;  %s3527_s1 = inlined_call_operand.hbm [shape: f32[128,256], index: 1, kind: input, shape index: {}]   ;;  %s3528_s2 = inlined_call_operand.vmem [shape: f32[1,256], index: 2, kind: input, shape index: {}]   ;;  %s3529_s3 = inlined_call_operand.vmem [shape: s32[1,256], index: 3, kind: input, shape index: {}]   ;;  %s3530_s4 = inlined_call_operand.vmem [shape: s32[1,256], index: 4, kind: input, shape index: {}]   ;;  %s3531_s5 = inlined_call_operand.vmem [shape: s32[144,4], index: 5, kind: output, shape index: {0}]   ;;  %s3532_s6 = inlined_call_operand.hbm [shape: f32[16,256], index: 6, kind: output, shape index: {1}]   ;;  %s3533_s7 = inlined_call_operand.hbm [shape: f32[512,128], index: 7, kind: output, shape index: {2}]   ;;  %s3534_s8 = inlined_call_operand.hbm [shape: f32[16,128], index: 8, kind: output, shape index: {3}]  }
   0x1   :  { %3556 = sst [smem:[#allocation20_spill]] %s3527_s1 }
   0x2   :  { %3557 = sst [smem:[#allocation21_spill]] %s3528_s2 }
   0x3   :  { %3558 = sst [smem:[#allocation22_spill]] %s3529_s3 }
   0x4   :  { %3559 = sst [smem:[#allocation23_spill]] %s3530_s4 }
   0x5   :  { %3560 = sst [smem:[#allocation24_spill]] %s3532_s6 }
   0x6   :  { %3561 = sst [smem:[#allocation25_spill]] %s3533_s7 }
   0x7   :  { %3562 = sst [smem:[#allocation26_spill]] %s3534_s8 }
   0x8   :  { %14 = vsyncpa [#allocation3], 0 }
   0x9   :  { %16 = vsyncpa [#allocation3 + $0x1], 0 }
   0xa   :  { %17 = vsyncpa [#allocation6], 0 }
   0xb   :  { %18 = vsyncpa [#allocation4], 0 }
   0xc   :  { %20 = vsyncpa [#allocation4 + $0x1], 0 }
   0xd   :  { %21 = vsyncpa [#allocation9], 0 }
   0xe   :  { %23 = vsyncpa [#allocation9 + $0x1], 0  ;;  %s2500_s27 = smov 0   ;;  %s2502_s28 = smov 0  }
   0xf   :  { %s2504_s29 = smov 0   ;;  %s2506_s30 = smov 0  }
  0x10   :  { %s2508_s9 = smov 0   ;;  %s2510_s10 = smov 0  }
  0x11   :  { %s2512_s11 = smov 0   ;;  %s2514_s12 = smov 0  }
  0x12   :  { %s2516_s13 = smov 0   ;;  %s2518_s14 = smov 0  }
  0x13   :  { %s2520_s15 = smov 0  }
  0x14 LB: > { %3563 = sst [smem:[#allocation15_spill]] %s2398_s27  ;;  %s2554_s16 = sadd.s32 4294967295, %s2438_s15   ;;  %s2438_s15 = sphi %s2520_s15, %s29_s15   ;;  %s2434_s14 = sphi %s2518_s14, %s3652_s14   ;;  %s2430_s13 = sphi %s2516_s13, %s3651_s13   ;;  %s2426_s12 = sphi %s2514_s12, %s3650_s12   ;;  %s2422_s11 = sphi %s2512_s11, %s3642_s11   ;;  %s2418_s10 = sphi %s2510_s10, %s3649_s10   ;;  %s2414_s9 = sphi %s2508_s9, %s3648_s9   ;;  %s2410_s30 = sphi %s2506_s30, %s3647_s30   ;;  %s2406_s29 = sphi %s2504_s29, %s3646_s29   ;;  %s2402_s28 = sphi %s2502_s28, %s3645_s28   ;;  %s2398_s27 = sphi %s2500_s27, %s3644_s27  }
  0x15   : > { %3564 = sst [smem:[#allocation16_spill]] %s2430_s13  ;;  %s3535_s17 = sadd.s32 4294967294, %s2438_s15  }
  0x16   : > { %p65_p0 = scmp.ne.s32.totalorder %s2414_s9, %s2410_s30  ;;  %p3539_p1 = scmp.eq.s32.totalorder %s2554_s16, 0 }
  0x17   : > { %p202_p2 = scmp.ne.s32.totalorder %s2406_s29, %s2402_s28  ;;  %p203_p4 = scmp.eq.s32.totalorder %s2554_s16, 5 }
  0x18   : > { %p2564_p3 = por %p3539_p1, %p65_p0  ;;  %p208_p5 = scmp.ne.s32.totalorder %s2402_s28, %s2398_s27 }
  0x19   : > { %p209_p6 = scmp.eq.s32.totalorder %s3535_s17, 5  ;;  %p2573_p7 = por %p203_p4, %p202_p2 }
  0x1a   : > { %s3565_s19 = scalar_select %p2564_p3, 1, 0 }
  0x1b   : > { %s3566_s20 = scalar_select %p2573_p7, 1, 0 }
  0x1c   : > { %p1850_p8 = scmp.ge.s32.totalorder %s2438_s15, 1  ;;  %p2578_p9 = por %p209_p6, %p208_p5 }
  0x1d   : > { %3567 = sst [smem:[#allocation17_spill]] %s3566_s20  ;;  %p268_p10 = scmp.lt.s32.totalorder %s2438_s15, 7 }
  0x1e   : > { %s3568_s21 = scalar_select %p2578_p9, 1, 0 }
  0x1f   : > { %p2583_p11 = pnand %p1850_p8, %p268_p10  ;;  %s2440_s23 = smov [#allocation5]  }
  0x20   : > { %3569 = sst [smem:[#allocation18_spill]] %s3568_s21  ;;  %s280_s24 = sshll.u32 %s2440_s23, 4  ;;  %s281_s24 = int_to_ptr.vmem [resolvable:$true] %s280_s24 }
  0x21   : > { %s3570_s22 = scalar_select %p2583_p11, 1, 0 }
  0x22   : > { %p2073_p12 = pneg %p2583_p11  ;;  %s3572_s1 = sld [smem:[#allocation20_spill]] }
  0x24   : > { %p2591_p13 = pnand %p2073_p12, %p3539_p1 }
  0x26   : > { %p2196_p2 = pneg %p2591_p13 }
  0x28   : > { %s2194_s17 = scalar_lea.hbm %s3572_s1, 4096 }
  0x29   : > { %p2195_p0 = scmp.ne.s32.totalorder %s3572_s1, %s2194_s17  ;;  %p2201_p6 = scmp.lt.u32.totalorder %s2194_s17, %s3572_s1 }
  0x2b   : > { %p2197_p4 = pnand %p2196_p2, %p2195_p0 }
  0x2d   : > { %p2198_p5 = pneg %p2197_p4 }
  0x2f   : > { %p2203_p8 = pnand %p2201_p6, %p2198_p5 }
  0x31   : > { %2206 = shalt.err (!%p2203_p8)
}
  0x32   : > { %s2207_s8 = scalar_lea.vmem %s281_s24, 4096  ;;  %p2215_p9 = scmp.lt.s32.totalorder %s281_s24, %s281_s24 }
  0x33   : > { %p2208_p10 = scmp.ne.s32.totalorder %s281_s24, %s2207_s8  ;;  %p2216_p7 = scmp.lt.s32.totalorder %s2207_s8, %s2207_s8 }
  0x35   : > { %p2210_p12 = pnand %p2208_p10, %p2196_p2  ;;  %p2217_p3 = por %p2216_p7, %p2215_p9 }
  0x37   : > { %p2211_p1 = pneg %p2210_p12 }
  0x39   : > { %p2218_p11 = pnand %p2217_p3, %p2211_p1 }
  0x3b   : > { %2221 = shalt.err (!%p2218_p11)
}
  0x3c   : > { %s2441_s18 = smov 256   ;;  %s2442_s27 = smov 16  }
  0x3d   : > { %2076 = dma.hbm_to_vmem [thread:$0]  (!%p2591_p13), %s3572_s1, 4096, %s281_s24, [#allocation6], %s2441_s18, %s2441_s18, %s2442_s27  }
  0x3e   : > { %s38_s21 = sadd.s32 1, %s2430_s13  ;;  %s41_s26 = sadd.s32 1, %s2434_s14 }
  0x3f   : > { %p39_p1 = scmp.ge.s32.totalorder %s38_s21, 3  ;;  %s45_s30 = smul.u32 3, %s2434_s14 }
  0x40   : > { %s52_s23 = sadd.s32 1, %s2418_s10  ;;  %p59_p3 = scmp.ne.s32.totalorder %s2418_s10, %s2414_s9 }
  0x41   : > { %s3654_s21 = smov (%p39_p1, %s38_s21), 0  ;;  %s3656_s26 = smov (!%p39_p1, %s41_s26), %s2434_s14 }
  0x42   : > { %s46_s7 = sadd.s32 %s2430_s13, %s45_s30  ;;  %p43_p7 = scmp.ge.s32.totalorder %s3656_s26, 2 }
  0x43   : > { %p60_p9 = scmp.eq.s32.totalorder %s2438_s15, 0  ;;  %p2092_p11 = scmp.lt.s32.totalorder %s2438_s15, 6 }
  0x44   : > { %s303_s25 = sand.u32 1, %s2418_s10   ;;  %s3658_s26 = smov (%p43_p7, %s3656_s26), 0 }
  0x45   : > { %3573 = sst [smem:[#allocation19_spill]] %s3658_s26  ;;  %p2626_p13 = por %p60_p9, %p59_p3 }
  0x46   : > { %s47_s18 = smul.u32 3, %s3658_s26  ;;  %s189_s27 = ssub.s32 %s2434_s14, %s3658_s26 }
  0x47   : > { %p190_p0 = scmp.eq.s32.totalorder %s189_s27, 0  ;;  %s2059_s17 = smul.u32 24, %s303_s25 }
  0x48   : > { %s48_s8 = sadd.s32 %s47_s18, %s3654_s21  ;;  %s1927_s30 = smul.u32 384, %s46_s7 }
  0x49   : > { %s49_s1 = ssub.s32 %s46_s7, %s48_s8  ;;  %s3575_s4 = sadd.s32 1, %s2406_s29 }
  0x4a   : > { %p50_p2 = scmp.eq.s32.totalorder %s49_s1, 0  ;;  %s2637_s20 = scalar_lea.hbm %s3526_s0, %s1927_s30 }
  0x4b   : > { %s2642_s3 = scalar_select %p190_p0, %s2406_s29, %s3575_s4  }
  0x4c   : > { %s2645_s2 = scalar_select %p50_p2, %s2418_s10, %s52_s23  }
  0x4d   : > { %s307_s27 = scalar_lea.vmem [#allocation2], %s2059_s17  ;;  %p2651_p4 = pnand %p2092_p11, %p2626_p13 }
  0x4e   : > { %s316_s26 = sshll.u32 %s307_s27, 4  ;;  %s2657_s6 = scalar_lea.sflag [#allocation3], %s303_s25  ;;  %s2655_s26 = int_to_ptr.vmem [resolvable:$true] %s316_s26 }
  0x4f   : > { %s2222_s7 = scalar_lea.hbm %s2637_s20, 384  ;;  %p2224_p6 = pneg %p2651_p4 }
  0x50   : > { %p2223_p5 = scmp.ne.s32.totalorder %s2637_s20, %s2222_s7  ;;  %s2227_s23 = scalar_lea.hbm %s3526_s0, 2304 }
  0x51   : > { %p2228_p12 = scmp.lt.u32.totalorder %s2637_s20, %s3526_s0  ;;  %p2229_p1 = scmp.lt.u32.totalorder %s2227_s23, %s2222_s7 }
  0x52   : > { %p2225_p8 = pnand %p2224_p6, %p2223_p5  ;;  %p2231_p7 = scmp.lt.u32.totalorder %s2222_s7, %s2637_s20 }
  0x53   : > { %p2230_p3 = por %p2229_p1, %p2228_p12 }
  0x54   : > { %p2226_p10 = pneg %p2225_p8 }
  0x55   : > { %p2232_p9 = por %p2231_p7, %p2230_p3 }
  0x57   : > { %p2233_p11 = pnand %p2232_p9, %p2226_p10 }
  0x59   : > { %2236 = shalt.err (!%p2233_p11)
}
  0x5a   : > { %s2237_s25 = scalar_lea.vmem %s2655_s26, 384  ;;  %s2443_s17 = smov [#allocation2]  }
  0x5b   : > { %p2238_p13 = scmp.ne.s32.totalorder %s2655_s26, %s2237_s25  ;;  %s2242_s8 = sshll.u32 %s2443_s17, 4  ;;  %s2243_s8 = int_to_ptr.vmem [resolvable:$false] %s2242_s8 }
  0x5c   : > { %s2244_s30 = scalar_lea.vmem %s2243_s8, 768  ;;  %p2245_p5 = scmp.lt.s32.totalorder %s2655_s26, %s2243_s8 }
  0x5d   : > { %p2240_p0 = pnand %p2238_p13, %p2224_p6  ;;  %p2246_p8 = scmp.lt.s32.totalorder %s2244_s30, %s2237_s25 }
  0x5f   : > { %p2241_p2 = pneg %p2240_p0  ;;  %p2247_p12 = por %p2246_p8, %p2245_p5 }
  0x61   : > { %p2248_p1 = pnand %p2247_p12, %p2241_p2 }
  0x63   : > { %2251 = shalt.err (!%p2248_p1)
}
  0x64   : > { %s2444_s27 = smov 128   ;;  %s2445_s7 = smov 8  }
  0x65   : > { %2080 = dma.hbm_to_vmem [thread:$0]  (!%p2651_p4), %s2637_s20, 384, %s2655_s26, %s2657_s6, %s2444_s27, %s2444_s27, %s2445_s7  }
  0x66   : > { %p3577_p6 = scmp.ne.s32.totalorder %s3570_s22, 0 }
  0x67   : > { %s330_s4 = sand.u32 (!%p3577_p6), 1, %s2414_s9   ;;  %p3578_p10 = scmp.ne.s32.totalorder (!%p3577_p6), %s3565_s19, 0 }
  0x68   : > { %328 = sbr.rel (%p3577_p6) target bundleno = 1374 (0x55e), region = 40  ;;  %s331_s23 = scalar_lea.sflag (!%p3577_p6), [#allocation3], %s330_s4 }
  0x69   : > { %s2060_s13 = smul.u32 (!%p3577_p6), 24, %s330_s4 }
  0x6b   : > { %s2688_s24 = scalar_lea.vmem (!%p3577_p6), [#allocation2], %s2060_s13 }
  0x6f   : > { %2381 = dma.done.wait (%p3578_p10), %s331_s23, 384  }
  0x70   : > { %2383 = vsyncadd (%p3578_p10), %s331_s23, 4294966912  ;;  %p3579_p3 = scmp.eq.s32.totalorder %s2554_s16, 0 }
  0x72   : > { %2385 = dma.done.wait (%p3579_p3), [#allocation6], 4096   ;;  %p3580_p4 = pmov %p3579_p3 }
  0x73   : > { %s2699_s20 = sand.u32 1, %s2402_s28   ;;  %s391_s22 = smul.u32 3, %s2426_s12 }
  0x74   : > { %2387 = vsyncadd (%p3580_p4), [#allocation6], 4294963200  ;;  %s1856_s26 = sshll.u32 %s2699_s20, 4  ;;  %s1857_s1 = sshll.u32 %s2699_s20, 8 }
  0x75   : > { %s1858_s6 = sshll.u32 %s2699_s20, 3  ;;  %s2706_s19 = sadd.s32 %s2422_s11, %s391_s22 }
  0x76   : > { %s393_s18 = smul.u32 3, %s2706_s19  ;;  %s2714_s27 = scalar_lea.vmem [#allocation7], %s1856_s26 }
  0x77   : > { %s2716_s7 = scalar_lea.vmem [#allocation8], %s1857_s1  ;;  %s2718_s4 = scalar_lea.vmem [#allocation10], %s1858_s6 }
  0x78   : > { %p394_p7 = scmp.lt.s32.totalorder %s393_s18, 17  ;;  %p1860_p9 = scmp.ne.s32.totalorder %s2422_s11, 0 }
  0x79   : > { %v2446_v0 = vmov (!%p1860_p9), 0.0  }
  0x7a   : > { %s3660_s18 = smov (!%p394_p7, %s393_s18), 17  ;;  %407 = sbr.rel (%p1860_p9) target bundleno = 141 (0x8d), region = 52 }
  0x7b   : > { %s1859_s25 = sshll.u32 %s3660_s18, 3  ;;  %408 = vst [vmem:[%s2714_s27] sm:$0xff] (!%p1860_p9), %v2446_v0  ;;  %409 = vst [vmem:[%s2714_s27 + $0x8] sm:$0xff] (!%p1860_p9), %v2446_v0 }
  0x7c   : > { %s2712_s30 = scalar_lea.vmem %s3531_s5, %s1859_s25  ;;  %410 = vst [vmem:[%s2716_s7] sm:$0xff] (!%p1860_p9), %v2446_v0  ;;  %411 = vst [vmem:[%s2716_s7 + $0x8] sm:$0xff] (!%p1860_p9), %v2446_v0 }
  0x7d   : > { %412 = vst [vmem:[%s2716_s7 + $0x10] sm:$0xff] (!%p1860_p9), %v2446_v0  ;;  %413 = vst [vmem:[%s2716_s7 + $0x18] sm:$0xff] (!%p1860_p9), %v2446_v0 }
  0x7e   : > { %414 = vst [vmem:[%s2716_s7 + $0x20] sm:$0xff] (!%p1860_p9), %v2446_v0  ;;  %415 = vst [vmem:[%s2716_s7 + $0x28] sm:$0xff] (!%p1860_p9), %v2446_v0 }
  0x7f   : > { %416 = vst [vmem:[%s2716_s7 + $0x30] sm:$0xff] (!%p1860_p9), %v2446_v0  ;;  %417 = vst [vmem:[%s2716_s7 + $0x38] sm:$0xff] (!%p1860_p9), %v2446_v0 }
  0x80   : > { %418 = vst [vmem:[%s2716_s7 + $0x40] sm:$0xff] (!%p1860_p9), %v2446_v0  ;;  %419 = vst [vmem:[%s2716_s7 + $0x48] sm:$0xff] (!%p1860_p9), %v2446_v0 }
  0x81   : > { %420 = vst [vmem:[%s2716_s7 + $0x50] sm:$0xff] %v2446_v0  ;;  %421 = vst [vmem:[%s2716_s7 + $0x58] sm:$0xff] %v2446_v0 }
  0x82   : > { %422 = vst [vmem:[%s2716_s7 + $0x60] sm:$0xff] %v2446_v0  ;;  %423 = vst [vmem:[%s2716_s7 + $0x68] sm:$0xff] %v2446_v0 }
  0x83   : > { %424 = vst [vmem:[%s2716_s7 + $0x70] sm:$0xff] %v2446_v0  ;;  %425 = vst [vmem:[%s2716_s7 + $0x78] sm:$0xff] %v2446_v0 }
  0x84   : > { %426 = vst [vmem:[%s2716_s7 + $0x80] sm:$0xff] %v2446_v0  ;;  %427 = vst [vmem:[%s2716_s7 + $0x88] sm:$0xff] %v2446_v0 }
  0x85   : > { %428 = vst [vmem:[%s2716_s7 + $0x90] sm:$0xff] %v2446_v0  ;;  %429 = vst [vmem:[%s2716_s7 + $0x98] sm:$0xff] %v2446_v0 }
  0x86   : > { %430 = vst [vmem:[%s2716_s7 + $0xa0] sm:$0xff] %v2446_v0  ;;  %431 = vst [vmem:[%s2716_s7 + $0xa8] sm:$0xff] %v2446_v0 }
  0x87   : > { %432 = vst [vmem:[%s2716_s7 + $0xb0] sm:$0xff] %v2446_v0  ;;  %433 = vst [vmem:[%s2716_s7 + $0xb8] sm:$0xff] %v2446_v0 }
  0x88   : > { %434 = vst [vmem:[%s2716_s7 + $0xc0] sm:$0xff] %v2446_v0  ;;  %435 = vst [vmem:[%s2716_s7 + $0xc8] sm:$0xff] %v2446_v0 }
  0x89   : > { %436 = vst [vmem:[%s2716_s7 + $0xd0] sm:$0xff] %v2446_v0  ;;  %437 = vst [vmem:[%s2716_s7 + $0xd8] sm:$0xff] %v2446_v0 }
  0x8a   : > { %438 = vst [vmem:[%s2716_s7 + $0xe0] sm:$0xff] %v2446_v0  ;;  %439 = vst [vmem:[%s2716_s7 + $0xe8] sm:$0xff] %v2446_v0 }
  0x8b   : > { %440 = vst [vmem:[%s2716_s7 + $0xf0] sm:$0xff] %v2446_v0  ;;  %441 = vst [vmem:[%s2716_s7 + $0xf8] sm:$0xff] %v2446_v0 }
  0x8c   : > { %442 = vst [vmem:[%s2718_s4] sm:$0xff] %v2446_v0 }
  0x8d PF: > { %v447_v1 = vld [vmem:[#allocation5 + $0x8] sm:$0xff]  ;;  %v449_v2 = vld [vmem:[#allocation5 + $0x18] sm:$0xff]  ;;  %v446_v3 = vld [vmem:[#allocation5] sm:$0xff]  ;;  %v2447_v8 = vmov 0.0   ;;  %v563_v59 = vlaneseq  ;;  %s3581_s23 = sld [smem:[#allocation21_spill]]  ;;  %vm592_vm0 = vcmask 523264  }
  0x8e   : > { %v2019_v4 = vpack.c.bf16 %v449_v2, %v447_v1  ;;  %v448_v5 = vld [vmem:[#allocation5 + $0x10] sm:$0xff]  ;;  %v451_v6 = vld [vmem:[#allocation5 + $0x28] sm:$0xff]  ;;  %v453_v7 = vld [vmem:[#allocation5 + $0x38] sm:$0xff]  ;;  %542 = vmatprep.mubr.f32.mxu0 %v2447_v8  ;;  %vm724_vm1 = vcmask 1048064   ;;  %s3582_s26 = sld [smem:[#allocation22_spill]]  ;;  %s2448_s1 = smov 64  }
  0x8f   : > { %v2021_v9 = vpack.c.bf16 %v448_v5, %v446_v3  ;;  %v2023_v10 = vpack.c.bf16 %v453_v7, %v451_v6  ;;  %v450_v11 = vld [vmem:[#allocation5 + $0x20] sm:$0xff]  ;;  %v452_v12 = vld [vmem:[#allocation5 + $0x30] sm:$0xff]  ;;  %v455_v13 = vld [vmem:[#allocation5 + $0x48] sm:$0xff]  ;;  %v2765_v60 = vshrl.u32 %v563_v59, 7  ;;  %s3583_s25 = sld [smem:[#allocation23_spill]]  ;;  %s581_s17 = smul.u32 24, %s2706_s19 }
  0x90   : > { %2020 = vmatprep.subr.bf16.mxu0 %v2019_v4  ;;  %v457_v14 = vld [vmem:[#allocation5 + $0x58] sm:$0xff]  ;;  %v2025_v15 = vpack.c.bf16 %v452_v12, %v450_v11  ;;  %v454_v17 = vld [vmem:[#allocation5 + $0x40] sm:$0xff]  ;;  %v456_v18 = vld [vmem:[#allocation5 + $0x50] sm:$0xff]  ;;  %s3632_s19 = sld [smem:[#allocation17_spill]]  ;;  %s1928_s8 = sshll.u32 %s2426_s12, 8 }
  0x91   : > { %2022 = vmatpush1.bf16.msra.mxu0 %v2021_v9  ;;  %v2027_v16 = vpack.c.bf16 %v457_v14, %v455_v13  ;;  %v459_v19 = vld [vmem:[#allocation5 + $0x68] sm:$0xff]  ;;  %v461_v20 = vld [vmem:[#allocation5 + $0x78] sm:$0xff]  ;;  %v2029_v21 = vpack.c.bf16 %v456_v18, %v454_v17  ;;  %v458_v23 = vld [vmem:[#allocation5 + $0x60] sm:$0xff]  ;;  %v2768_v61 = vsub.s32 0, %v2765_v60  ;;  %v2775_v0 = vsub.s32 1, %v2765_v60  ;;  %s3633_s13 = sld [smem:[#allocation24_spill]] }
  0x92   : > { %2024 = vmatprep.subr.bf16.mxu0 %v2023_v10  ;;  %v2031_v22 = vpack.c.bf16 %v461_v20, %v459_v19  ;;  %v460_v24 = vld [vmem:[#allocation5 + $0x70] sm:$0xff]  ;;  %v463_v25 = vld [vmem:[#allocation5 + $0x88] sm:$0xff]  ;;  %v465_v26 = vld [vmem:[#allocation5 + $0x98] sm:$0xff]  ;;  %s1638_s22 = sshll.u32 %s2714_s27, 4  ;;  %s2450_s6 = smov [#allocation7]   ;;  %s1639_s22 = int_to_ptr.vmem [resolvable:$true] %s1638_s22 }
  0x93   : > { %v443_v27 = vld [vmem:[%s2688_s24] sm:$0xff]  ;;  %v444_v29 = vld [vmem:[%s2688_s24 + $0x8] sm:$0xff]  ;;  %v445_v30 = vld [vmem:[%s2688_s24 + $0x10] sm:$0xff]  ;;  %v2033_v31 = vpack.c.bf16 %v460_v24, %v458_v23  ;;  %v2035_v35 = vpack.c.bf16 %v465_v26, %v463_v25  ;;  %s2256_s18 = sshll.u32 %s2450_s6, 4  ;;  %s2257_s18 = int_to_ptr.vmem [resolvable:$false] %s2256_s18 }
  0x94   : > { %v1587_v28 = vmul.f32 %v443_v27, %v443_v27  ;;  %v2051_v32 = vpack.c.bf16 %v444_v29, %v443_v27  ;;  %v1588_v33 = vmul.f32 %v444_v29, %v444_v29  ;;  %v1589_v34 = vmul.f32 %v445_v30, %v445_v30  ;;  %v462_v36 = vld [vmem:[#allocation5 + $0x80] sm:$0xff]  ;;  %v464_v37 = vld [vmem:[#allocation5 + $0x90] sm:$0xff]  ;;  %v467_v38 = vld [vmem:[#allocation5 + $0xa8] sm:$0xff]  ;;  %p2259_p5 = scmp.lt.s32.totalorder %s1639_s22, %s2257_s18 }
  0x95   : > { %2026 = vmatpush1.bf16.msra.mxu0 %v2025_v15  ;;  %v469_v39 = vld [vmem:[#allocation5 + $0xb8] sm:$0xff]  ;;  %v2037_v41 = vpack.c.bf16 %v464_v37, %v462_v36  ;;  %v466_v44 = vld [vmem:[#allocation5 + $0xa0] sm:$0xff]  ;;  %v468_v45 = vld [vmem:[#allocation5 + $0xb0] sm:$0xff] }
  0x96   : > { %2028 = vmatprep.subr.bf16.mxu0 %v2027_v16  ;;  %v1590_v40 = vadd.f32 %v1588_v33, %v1587_v28  ;;  %2055 = vmatprep.subr.bf16.mxu1 %v2051_v32  ;;  %v2039_v43 = vpack.c.bf16 %v469_v39, %v467_v38  ;;  %v471_v46 = vld [vmem:[#allocation5 + $0xc8] sm:$0xff]  ;;  %v473_v47 = vld [vmem:[#allocation5 + $0xd8] sm:$0xff]  ;;  %v2041_v48 = vpack.c.bf16 %v468_v45, %v466_v44  ;;  %v470_v50 = vld [vmem:[#allocation5 + $0xc0] sm:$0xff]  ;;  %p3635_p13 = scmp.ne.s32.totalorder %s3632_s19, 0 }
  0x97   : > { %2057 = vmatpush3.bf16.msra.mxu1 %v2051_v32  ;;  %v2043_v49 = vpack.c.bf16 %v473_v47, %v471_v46  ;;  %v472_v51 = vld [vmem:[#allocation5 + $0xd0] sm:$0xff]  ;;  %v475_v52 = vld [vmem:[#allocation5 + $0xe8] sm:$0xff]  ;;  %v477_v53 = vld [vmem:[#allocation5 + $0xf8] sm:$0xff]  ;;  %s3336_s24 = scalar_lea.hbm %s3633_s13, %s1928_s8 }
  0x98   : > { %v2760_v42 = vadd.f32 %v1590_v40, %v1589_v34  ;;  %2056 = vmatprep.subr.mxu1 %v445_v30  ;;  %v2045_v54 = vpack.c.bf16 %v472_v51, %v470_v50  ;;  %v2047_v55 = vpack.c.bf16 %v477_v53, %v475_v52  ;;  %v474_v56 = vld [vmem:[#allocation5 + $0xe0] sm:$0xff]  ;;  %v476_v57 = vld [vmem:[#allocation5 + $0xf0] sm:$0xff] }
  0x99   : > { %2030 = vmatpush1.bf16.msra.mxu0 %v2029_v21  ;;  %v2049_v58 = vpack.c.bf16 %v476_v57, %v474_v56  ;;  %v561_v62 = vld [vmem:[%s3581_s23] sm:$0x3]  ;;  %s3634_s23 = smov %s3633_s13 }
  0x9a   : > { %2032 = vmatprep.subr.bf16.mxu0 %v2031_v22  ;;  %v566_v63 = vrot.slane %v561_v62, %v2768_v61  ;;  %v570_v4 = vrot.slane %v561_v62, %v2775_v0 }
  0x9b   : > { %2058 = vmatpush3.msra.mxu1 %v445_v30 }
  0x9d   : > { %2034 = vmatpush1.bf16.msra.mxu0 %v2033_v31 }
  0x9e   : > { %2036 = vmatprep.subr.bf16.mxu0 %v2035_v35 }
  0xa1   : > { %2038 = vmatpush1.bf16.msra.mxu0 %v2037_v41 }
  0xa2   : > { %2040 = vmatprep.subr.bf16.mxu0 %v2039_v43 }
  0xa5   : > { %2042 = vmatpush1.bf16.msra.mxu0 %v2041_v48 }
  0xa6   : > { %2044 = vmatprep.subr.bf16.mxu0 %v2043_v49 }
  0xa9   : > { %2046 = vmatpush1.bf16.msra.mxu0 %v2045_v54 }
  0xaa   : > { %2048 = vmatprep.subr.bf16.mxu0 %v2047_v55 }
  0xad   : > { %2050 = vmatpush1.bf16.msra.mxu0 %v2049_v58 }
  0xae   : > { %2052 = vmatprep.subr.bf16.mxu0 %v2051_v32 }
  0xb0   : > { %543 = vmatmul.mubr.f32.vlgmr.msra.gmra.mrb[0].mxu0 %v443_v27  ;;  %v2813_v27 = vld [vmem:[%s3582_s26] sm:$0x3]  ;;  %s1608_s26 = scalar_lea.sflag [#allocation4], %s2699_s20 }
  0xb1   : > { %548 = vmatprep.mubr.f32.mxu0 %v2447_v8  ;;  %2054 = vmatpush3.bf16.msra.mxu0 %v2051_v32  ;;  %v2817_v28 = vrot.slane %v2813_v27, %v2768_v61 }
  0xb2   : > { %1969 = vmatprep.subr.mxu0 %v445_v30 }
  0xb4   : > { %549 = vmatmul.mubr.f32.gmra.mrb[2].mxu0 %v444_v29 }
  0xb5   : > { %554 = vmatprep.mubr.f32.mxu0 %v2447_v8  ;;  %1970 = vmatpush3.msra.mxu0 %v445_v30 }
  0xb8   : > { %555 = vmatmul.mubr.f32.gmra.mrb[4].mxu0 %v445_v30 }
 0x183   : > { %v544_v1 = vpop.f32.mrb[0].mxu0 }
 0x184   : > { %v2777_v2 = vsub.f32 %v566_v63, %v544_v1  ;;  %v546_v3 = vpop.f32.mrb[1].mxu0 }
 0x185   : > { %v2784_v10 = vsub.f32 %v570_v4, %v546_v3 }
 0x186   : > { %v593_v5 = vsel %vm592_vm0, %v2777_v2, inf  ;;  %v725_v11 = vsel %vm724_vm1, %v2777_v2, inf }
 0x187   : > { %594 = vmin.xlane.f32.xlu0 %v593_v5  ;;  %v550_v6 = vpop.f32.mrb[2].mxu0  ;;  %v844_v17 = vsel %vm592_vm0, %v2784_v10, inf  ;;  %v961_v20 = vsel %vm724_vm1, %v2784_v10, inf }
 0x188   : > { %v2782_v7 = vsub.f32 %v566_v63, %v550_v6  ;;  %v552_v9 = vpop.f32.mrb[3].mxu0 }
 0x189   : > { %v2792_v15 = vsub.f32 %v570_v4, %v552_v9 }
 0x18a   : > { %v596_v12 = vsel %vm592_vm0, %v2782_v7, inf  ;;  %v728_v14 = vsel %vm724_vm1, %v2782_v7, inf }
 0x18b   : > { %726 = vmin.xlane.f32.xlu0 %v725_v11  ;;  %597 = vmin.xlane.f32.xlu1 %v596_v12  ;;  %v556_v13 = vpop.f32.mrb[4].mxu0  ;;  %v847_v18 = vsel %vm592_vm0, %v2792_v15, inf  ;;  %v964_v21 = vsel %vm724_vm1, %v2792_v15, inf }
 0x18c   : > { %v558_v16 = vpop.f32.mrb[5].mxu0  ;;  %v577_v19 = vsub.f32 %v566_v63, %v556_v13 }
 0x18d   : > { %v2803_v23 = vsub.f32 %v570_v4, %v558_v16 }
 0x18e   : > { %v599_v22 = vsel %vm592_vm0, %v577_v19, inf  ;;  %v731_v24 = vsel %vm724_vm1, %v577_v19, inf }
 0x18f   : > { %845 = vmin.xlane.f32.xlu0 %v844_v17  ;;  %729 = vmin.xlane.f32.xlu1 %v728_v14  ;;  %v850_v25 = vsel %vm592_vm0, %v2803_v23, inf  ;;  %v967_v26 = vsel %vm724_vm1, %v2803_v23, inf }
 0x193   : > { %962 = vmin.xlane.f32.xlu0 %v961_v20  ;;  %848 = vmin.xlane.f32.xlu1 %v847_v18 }
 0x197   : > { %965 = vmin.xlane.f32.xlu0 %v964_v21  ;;  %600 = vmin.xlane.f32.xlu1 %v599_v22 }
 0x19b   : > { %732 = vmin.xlane.f32.xlu0 %v731_v24  ;;  %851 = vmin.xlane.f32.xlu1 %v850_v25 }
 0x19f   : > { %968 = vmin.xlane.f32.xlu1 %v967_v26 }
 0x1b1   : > { %737 = vrot.lane.b32.xlu0 %v2817_v28, %s2448_s1  ;;  %s2252_s1 = scalar_lea.vmem %s1639_s22, 256 }
 0x1b2   : > { %p2253_p11 = scmp.ne.s32.totalorder %s1639_s22, %s2252_s1 }
 0x1b4   : > { %p2254_p0 = pnand %p2253_p11, %p3635_p13 }
 0x1b6   : > { %p2255_p2 = pneg %p2254_p0 }
 0x214   : > { %v595_v29 = vpop.xlane.xlu0 %594 }
 0x215   : > { %vm602_vm2 = vcmp.eq.f32.partialorder %v2777_v2, %v595_v29 }
 0x216   : > { %v609_v30 = vsel %vm602_vm2, %v2817_v28, 64 }
 0x217   : > { %v2823_v31 = vsel %vm592_vm0, %v609_v30, 2147483647 }
 0x218   : > { %v727_v32 = vpop.xlane.xlu0 %726  ;;  %v614_v33 = vshra.s32 %v2823_v31, 16  ;;  %v598_v36 = vpop.xlane.xlu1 %597 }
 0x219   : > { %vm734_vm4 = vcmp.eq.f32.partialorder %v2777_v2, %v727_v32  ;;  %vm603_vm5 = vcmp.eq.f32.partialorder %v2782_v7, %v598_v36  ;;  %v613_v36 = vand.u32 65535, %v2823_v31 }
 0x21a   : > { %v2826_v34 = vcvt.s32.f32 %v614_v33  ;;  %v610_v50 = vsel %vm603_vm5, %v2817_v28, 64 }
 0x21b   : > { %v2851_v57 = vsel %vm592_vm0, %v610_v50, 2147483647 }
 0x21c   : > { %v846_v35 = vpop.xlane.xlu0 %845  ;;  %617 = vmin.xlane.f32.xlu1 %v2826_v34  ;;  %v730_v39 = vpop.xlane.xlu1 %729  ;;  %v629_v63 = vshra.s32 %v2851_v57, 16 }
 0x21d   : > { %vm853_vm3 = vcmp.eq.f32.partialorder %v2784_v10, %v846_v35  ;;  %vm735_vm7 = vcmp.eq.f32.partialorder %v2782_v7, %v730_v39 }
 0x21e   : > { %v856_v41 = vsel %vm853_vm3, %v2817_v28, 64  ;;  %v2865_v3 = vcvt.s32.f32 %v629_v63 }
 0x21f   : > { %v2834_v47 = vsel %vm592_vm0, %v856_v41, 2147483647 }
 0x220   : > { %v963_v37 = vpop.xlane.xlu0 %962  ;;  %v849_v43 = vpop.xlane.xlu1 %848  ;;  %v861_v56 = vshra.s32 %v2834_v47, 16 }
 0x221   : > { %vm854_vm9 = vcmp.eq.f32.partialorder %v2792_v15, %v849_v43  ;;  %vm970_vm10 = vcmp.eq.f32.partialorder %v2784_v10, %v963_v37 }
 0x222   : > { %v2856_v62 = vcvt.s32.f32 %v861_v56  ;;  %v857_v6 = vsel %vm854_vm9, %v2817_v28, 64 }
 0x223   : > { %v874_v11 = vsel %vm592_vm0, %v857_v6, 2147483647 }
 0x224   : > { %v966_v38 = vpop.xlane.xlu0 %965  ;;  %v601_v53 = vpop.xlane.xlu1 %600  ;;  %v876_v16 = vshra.s32 %v874_v11, 16 }
 0x225   : > { %vm604_vm8 = vcmp.eq.f32.partialorder %v577_v19, %v601_v53  ;;  %vm971_vm11 = vcmp.eq.f32.partialorder %v2792_v15, %v966_v38  ;;  %v615_v38 = vcvt.s32.f32 %v613_v36 }
 0x226   : > { %v611_v2 = vsel %vm604_vm8, %v2817_v28, 64  ;;  %v878_v20 = vcvt.s32.f32 %v876_v16 }
 0x227   : > { %v2869_v5 = vsel %vm592_vm0, %v611_v2, 2147483647 }
 0x228   : > { %v733_v40 = vpop.xlane.xlu0 %732  ;;  %v644_v9 = vshra.s32 %v2869_v5, 16  ;;  %v852_v12 = vpop.xlane.xlu1 %851 }
 0x229   : > { %vm736_vm6 = vcmp.eq.f32.partialorder %v577_v19, %v733_v40  ;;  %vm855_vm12 = vcmp.eq.f32.partialorder %v2803_v23, %v852_v12 }
 0x22a   : > { %v2876_v14 = vcvt.s32.f32 %v644_v9  ;;  %v858_v22 = vsel %vm855_vm12, %v2817_v28, 64 }
 0x22b   : > { %v2889_v25 = vsel %vm592_vm0, %v858_v22, 2147483647 }
 0x22c   : > { %v738_v44 = vpop.permute.xlu0 %737  ;;  %v969_v19 = vpop.xlane.xlu1 %968  ;;  %v891_v30 = vshra.s32 %v2889_v25, 16  ;;  %v890_v16 = vand.u32 65535, %v2889_v25 }
 0x22d   : > { %v741_v45 = vsel %vm736_vm6, %v738_v44, 64  ;;  %v739_v46 = vsel %vm734_vm4, %v738_v44, 64  ;;  %v740_v58 = vsel %vm735_vm7, %v738_v44, 64  ;;  %v973_v13 = vsel %vm970_vm10, %v738_v44, 64 }
 0x22e   : > { %v2837_v48 = vsel %vm724_vm1, %v741_v45, 2147483647  ;;  %v2840_v49 = vsel %vm724_vm1, %v739_v46, 2147483647  ;;  %v2860_v1 = vsel %vm724_vm1, %v740_v58, 2147483647  ;;  %vm972_vm13 = vcmp.eq.f32.partialorder %v2803_v23, %v969_v19 }
 0x22f   : > { %v774_v51 = vshra.s32 %v2837_v48, 16  ;;  %v744_v52 = vshra.s32 %v2840_v49, 16  ;;  %v759_v4 = vshra.s32 %v2860_v1, 16  ;;  %v976_v17 = vsel %vm724_vm1, %v973_v13, 2147483647 }
 0x230   : > { %v974_v18 = vsel %vm971_vm11, %v738_v44, 64  ;;  %v978_v10 = vshra.s32 %v976_v17, 16  ;;  %v975_v26 = vsel %vm972_vm13, %v738_v44, 64  ;;  %v2898_v33 = vcvt.s32.f32 %v891_v30 }
 0x231   : > { %v2845_v54 = vcvt.s32.f32 %v774_v51  ;;  %v2847_v55 = vcvt.s32.f32 %v744_v52  ;;  %v761_v7 = vcvt.s32.f32 %v759_v4  ;;  %v2883_v21 = vsel %vm724_vm1, %v974_v18, 2147483647 }
 0x232   : > { %v980_v24 = vcvt.s32.f32 %v978_v10  ;;  %v993_v15 = vshra.s32 %v2883_v21, 16  ;;  %v2895_v32 = vsel %vm724_vm1, %v975_v26, 2147483647  ;;  %v743_v40 = vand.u32 65535, %v2840_v49 }
 0x233   : > { %777 = vmin.xlane.f32.xlu0 %v2845_v54  ;;  %747 = vmin.xlane.f32.xlu1 %v2847_v55  ;;  %v1008_v23 = vshra.s32 %v2895_v32, 16  ;;  %v860_v44 = vand.u32 65535, %v2834_v47  ;;  %v758_v49 = vand.u32 65535, %v2860_v1  ;;  %v977_v63 = vand.u32 65535, %v976_v17 }
 0x234   : > { %v2891_v29 = vcvt.s32.f32 %v993_v15  ;;  %v745_v43 = vcvt.s32.f32 %v743_v40  ;;  %v892_v19 = vcvt.s32.f32 %v890_v16  ;;  %v2963_v30 = vrot.slane %v2813_v27, %v2775_v0 }
 0x235   : > { %v2902_v35 = vcvt.s32.f32 %v1008_v23  ;;  %v862_v46 = vcvt.s32.f32 %v860_v44  ;;  %v760_v47 = vcvt.s32.f32 %v758_v49  ;;  %v979_v6 = vcvt.s32.f32 %v977_v63  ;;  %v2969_v23 = vld [vmem:[%s3583_s25] sm:$0x3]  ;;  %s2258_s25 = scalar_lea.vmem %s2257_s18, 512 }
 0x236   : > { %vm667_vm11 = vcmp.eq.s32.totalorder %v2969_v23, 0  ;;  %vm793_vm12 = vcmp.eq.s32.totalorder %v2969_v23, 1  ;;  %v2988_v44 = vstv %s581_s17  ;;  %p2260_p8 = scmp.lt.s32.totalorder %s2258_s25, %s2252_s1 }
 0x237   : > { %864 = vmin.xlane.f32.xlu1 %v2856_v62 }
 0x238   : > { %p2261_p12 = por %p2260_p8, %p2259_p5 }
 0x23a   : > { %p2262_p1 = pnand %p2261_p12, %p2255_p2 }
 0x23b   : > { %632 = vmin.xlane.f32.xlu1 %v2865_v3 }
 0x23f   : > { %762 = vmin.xlane.f32.xlu1 %v761_v7 }
 0x243   : > { %647 = vmin.xlane.f32.xlu1 %v2876_v14 }
 0x247   : > { %879 = vmin.xlane.f32.xlu1 %v878_v20 }
 0x24b   : > { %981 = vmin.xlane.f32.xlu1 %v980_v24 }
 0x24f   : > { %996 = vmin.xlane.f32.xlu1 %v2891_v29 }
 0x253   : > { %894 = vmin.xlane.f32.xlu1 %v2898_v33 }
 0x257   : > { %1011 = vmin.xlane.f32.xlu1 %v2902_v35 }
 0x2a9   : > { %v2906_v37 = vpop.xlane.xlu1 %617 }
 0x2aa   : > { %vm619_vm14 = vcmp.eq.f32.partialorder %v2826_v34, %v2906_v37  ;;  %v624_v25 = vcvt.f32.s32 %v2906_v37 }
 0x2ab   : > { %v620_v39 = vsel %vm619_vm14, %v615_v38, inf }
 0x2ac   : > { %621 = vmin.xlane.f32.xlu1 %v620_v39  ;;  %v2979_v39 = vand.u32 127, %v563_v59 }
 0x2c0   : > { %v2911_v41 = vpop.xlane.xlu1 %747 }
 0x2c1   : > { %vm749_vm15 = vcmp.eq.f32.partialorder %v2847_v55, %v2911_v41  ;;  %v875_v55 = vand.u32 65535, %v874_v11 }
 0x2c2   : > { %v750_v45 = vsel %vm749_vm15, %v745_v43, inf  ;;  %v754_v43 = vcvt.f32.s32 %v2911_v41  ;;  %vm910_vm15 = vcmp.eq.s32.totalorder %v2969_v23, 2  ;;  %v584_v41 = vadd.s32 8, %v2765_v60 }
 0x2c3   : > { %751 = vmin.xlane.f32.xlu1 %v750_v45  ;;  %v877_v58 = vcvt.s32.f32 %v875_v55 }
 0x2c4   : > { %v2916_v31 = vpop.xlane.xlu1 %864  ;;  %v755_v55 = vshll.u32 %v754_v43, 16 }
 0x2c5   : > { %vm866_vm0 = vcmp.eq.f32.partialorder %v2856_v62, %v2916_v31  ;;  %v643_v62 = vand.u32 65535, %v2869_v5  ;;  %v2940_v5 = vpop.xlane.xlu0 %777 }
 0x2c6   : > { %v867_v34 = vsel %vm866_vm0, %v862_v46, inf  ;;  %vm779_vm6 = vcmp.eq.f32.partialorder %v2845_v54, %v2940_v5 }
 0x2c7   : > { %868 = vmin.xlane.f32.xlu1 %v867_v34  ;;  %v645_v4 = vcvt.s32.f32 %v643_v62  ;;  %v871_v34 = vcvt.f32.s32 %v2916_v31 }
 0x2c8   : > { %v2920_v50 = vpop.xlane.xlu1 %632 }
 0x2c9   : > { %vm634_vm5 = vcmp.eq.f32.partialorder %v2865_v3, %v2920_v50  ;;  %v992_v3 = vand.u32 65535, %v2883_v21  ;;  %v872_v63 = vshll.u32 %v871_v34, 16 }
 0x2cb   : > { %v994_v54 = vcvt.s32.f32 %v992_v3  ;;  %v3594_v3 = vmov 0 }
 0x2cc   : > { %v2923_v51 = vpop.xlane.xlu1 %762 }
 0x2cd   : > { %vm764_vm1 = vcmp.eq.f32.partialorder %v761_v7, %v2923_v51  ;;  %v628_v7 = vand.u32 65535, %v2851_v57 }
 0x2ce   : > { %v765_v52 = vsel %vm764_vm1, %v760_v47, inf }
 0x2cf   : > { %766 = vmin.xlane.f32.xlu0 %v765_v52  ;;  %v630_v13 = vcvt.s32.f32 %v628_v7  ;;  %v3006_v52 = vadd.s32 %v2988_v44, %v2765_v60 }
 0x2d0   : > { %v2926_v53 = vpop.xlane.xlu1 %647 }
 0x2d1   : > { %vm649_vm3 = vcmp.eq.f32.partialorder %v2876_v14, %v2926_v53  ;;  %v773_v14 = vand.u32 65535, %v2837_v48  ;;  %v635_v17 = vsel %vm634_vm5, %v630_v13, inf }
 0x2d2   : > { %v650_v9 = vsel %vm649_vm3, %v645_v4, inf }
 0x2d3   : > { %v775_v18 = vcvt.s32.f32 %v773_v14 }
 0x2d4   : > { %v2928_v56 = vpop.xlane.xlu1 %879 }
 0x2d5   : > { %vm881_vm2 = vcmp.eq.f32.partialorder %v878_v20, %v2928_v56  ;;  %v1007_v20 = vand.u32 65535, %v2895_v32  ;;  %v780_v10 = vsel %vm779_vm6, %v775_v18, inf  ;;  %vm3552_vm6 = vcmp.eq.s32.totalorder %v2979_v39, 1 }
 0x2d6   : > { %v882_v2 = vsel %vm881_vm2, %v877_v58, inf  ;;  %vm3550_vm2 = vcmp.eq.s32.totalorder %v2979_v39, 0 }
 0x2d7   : > { %883 = vmin.xlane.f32.xlu0 %v882_v2 }
 0x2d8   : > { %v2934_v1 = vpop.xlane.xlu1 %981 }
 0x2d9   : > { %vm983_vm4 = vcmp.eq.f32.partialorder %v980_v24, %v2934_v1  ;;  %v1009_v24 = vcvt.s32.f32 %v1007_v20 }
 0x2da   : > { %v984_v11 = vsel %vm983_vm4, %v979_v6, inf }
 0x2db   : > { %651 = vmin.xlane.f32.xlu0 %v650_v9  ;;  %985 = vmin.xlane.f32.xlu1 %v984_v11 }
 0x2dc   : > { %v2942_v12 = vpop.xlane.xlu1 %996 }
 0x2dd   : > { %vm998_vm8 = vcmp.eq.f32.partialorder %v2891_v29, %v2942_v12  ;;  %v625_v29 = vshll.u32 %v624_v25, 16 }
 0x2de   : > { %v999_v21 = vsel %vm998_vm8, %v994_v54, inf }
 0x2df   : > { %636 = vmin.xlane.f32.xlu1 %v635_v17  ;;  %v769_v17 = vcvt.f32.s32 %v2923_v51 }
 0x2e0   : > { %v2948_v57 = vpop.xlane.xlu1 %894 }
 0x2e1   : > { %vm896_vm7 = vcmp.eq.f32.partialorder %v2898_v33, %v2948_v57 }
 0x2e2   : > { %v897_v48 = vsel %vm896_vm7, %v892_v19, inf  ;;  %vm3549_vm7 = vcmp.lt.s32.totalorder %v3006_v52, 128 }
 0x2e3   : > { %781 = vmin.xlane.f32.xlu1 %v780_v10  ;;  %898 = vmin.xlane.f32.xlu0 %v897_v48 }
 0x2e4   : > { %v2956_v22 = vpop.xlane.xlu1 %1011 }
 0x2e5   : > { %vm1013_vm9 = vcmp.eq.f32.partialorder %v2902_v35, %v2956_v22  ;;  %v2449_v35 = vmov 0  }
 0x2e6   : > { %v1014_v15 = vsel %vm1013_vm9, %v1009_v24, inf  ;;  %v668_v36 = vsel %vm667_vm11, 1, %v2449_v35  ;;  %v794_v38 = vsel %vm793_vm12, 1, %v2449_v35  ;;  %v911_v47 = vsel %vm910_vm15, 1, %v2449_v35 }
 0x2e7   : > { %1000 = vmin.xlane.f32.xlu1 %v999_v21  ;;  %1015 = vmin.xlane.f32.xlu0 %v1014_v15  ;;  %v672_v37 = vrot.slane %v668_v36, %v2768_v61  ;;  %v676_v27 = vrot.slane %v668_v36, %v2775_v0  ;;  %v798_v46 = vrot.slane %v794_v38, %v2768_v61  ;;  %vm3551_vm11 = vcmp.eq.s32.totalorder %v2979_v39, 2 }
 0x2e8   : > { %v802_v59 = vrot.slane %v794_v38, %v2775_v0  ;;  %v915_v4 = vrot.slane %v911_v47, %v2768_v61  ;;  %v919_v6 = vrot.slane %v911_v47, %v2775_v0  ;;  %v886_v47 = vcvt.f32.s32 %v2928_v56 }
 0x2e9   : > { %vm2981_vm13 = vcmp.eq.s32.totalorder %v672_v37, 1  ;;  %vm2990_vm0 = vcmp.eq.s32.totalorder %v676_v27, 1  ;;  %vm3013_vm4 = vcmp.eq.s32.totalorder %v798_v46, 1  ;;  %v770_v27 = vshll.u32 %v769_v17, 16 }
 0x2ea   : > { %vm3017_vm5 = vcmp.eq.s32.totalorder %v802_v59, 1  ;;  %vm3045_vm15 = vcmp.eq.s32.totalorder %v919_v6, 1  ;;  %v1018_v56 = vcvt.f32.s32 %v2956_v22 }
 0x339   : > { %v622_v26 = vpop.xlane.xlu1 %621 }
 0x33a   : > { %v623_v32 = vcvt.f32.s32 %v622_v26 }
 0x33c   : > { %v626_v33 = vadd.s32 %v625_v29, %v623_v32 }
 0x33e   : > { %vm662_vm10 = vcmp.eq.s32.totalorder %v2963_v30, %v626_v33  ;;  %vm661_vm14 = vcmp.eq.s32.totalorder %v2817_v28, %v626_v33  ;;  %v721_v7 = vsel %vm3550_vm2, %v626_v33, 0  ;;  %vm3602_vm2 = vcmp.eq.s32.totalorder %v2979_v39, 2 }
 0x33f   : > { %vm2999_vm1 = vmand %vm661_vm14, %vm2981_vm13  ;;  %vm3041_vm14 = vcmp.eq.s32.totalorder %v915_v4, 1  ;;  %v585_v4 = vadd.s32 16, %v2765_v60 }
 0x340   : > { %vm680_vm3 = vmand %vm662_vm10, %vm2990_vm0  ;;  %v1861_v13 = vsel %vm2999_vm1, 1.0, %v2447_v8  ;;  %v3595_v3 = vsel %vm3041_vm14, 4294967295, %v3594_v3 }
 0x341   : > { %v1862_v11 = vsel %vm680_vm3, 1.0, %v2447_v8  ;;  %v706_v54 = vsel %vm3549_vm7, %v1861_v13, 0.0  ;;  %v3109_v13 = vadd.s32 %v2988_v44, %v585_v4 }
 0x342   : > { %v707_v10 = vsel %vm3549_vm7, %v1862_v11, 0.0 }
 0x350   : > { %v752_v49 = vpop.xlane.xlu1 %751 }
 0x351   : > { %v753_v31 = vcvt.f32.s32 %v752_v49  ;;  %v784_v49 = vcvt.f32.s32 %v2940_v5  ;;  %v901_v5 = vcvt.f32.s32 %v2948_v57 }
 0x353   : > { %v756_v2 = vadd.s32 %v755_v55, %v753_v31  ;;  %v639_v55 = vcvt.f32.s32 %v2920_v50  ;;  %v654_v31 = vcvt.f32.s32 %v2926_v53  ;;  %v3096_v50 = vshll.u32 %v784_v49, 16 }
 0x354   : > { %v869_v9 = vpop.xlane.xlu1 %868  ;;  %v887_v53 = vshll.u32 %v886_v47, 16 }
 0x355   : > { %vm787_vm8 = vcmp.eq.s32.totalorder %v2817_v28, %v756_v2  ;;  %vm788_vm9 = vcmp.eq.s32.totalorder %v2963_v30, %v756_v2  ;;  %v838_v14 = vsel %vm3552_vm6, %v756_v2, 0  ;;  %v870_v16 = vcvt.f32.s32 %v869_v9 }
 0x356   : > { %vm805_vm10 = vmand %vm787_vm8, %vm3013_vm4  ;;  %v841_v18 = vadd.s32 %v838_v14, %v721_v7  ;;  %v1003_v2 = vcvt.f32.s32 %v2942_v12  ;;  %v3094_v7 = vadd.s32 %v2988_v44, %v584_v41  ;;  %v640_v12 = vshll.u32 %v639_v55, 16 }
 0x357   : > { %vm806_vm12 = vmand %vm788_vm9, %vm3017_vm5  ;;  %v873_v19 = vadd.s32 %v872_v63, %v870_v16  ;;  %v1867_v51 = vsel %vm805_vm10, 1.0, %v2447_v8  ;;  %vm1027_vm10 = vcmp.eq.s32.totalorder %v2969_v23, 3  ;;  %v988_v63 = vcvt.f32.s32 %v2934_v1 }
 0x358   : > { %v1868_v48 = vsel %vm806_vm12, 1.0, %v2447_v8  ;;  %v823_v24 = vsel %vm3549_vm7, %v1867_v51, 0.0  ;;  %v1028_v23 = vsel %vm1027_vm10, 1, %v2449_v35  ;;  %v655_v9 = vshll.u32 %v654_v31, 16 }
 0x359   : > { %vm904_vm1 = vcmp.eq.s32.totalorder %v2817_v28, %v873_v19  ;;  %vm905_vm3 = vcmp.eq.s32.totalorder %v2963_v30, %v873_v19  ;;  %v955_v21 = vsel %vm3551_vm11, %v873_v19, 0  ;;  %v824_v15 = vsel %vm3549_vm7, %v1868_v48, 0.0 }
 0x35a   : > { %v3063_v25 = vadd.s32 %v955_v21, %v841_v18  ;;  %v830_v26 = vadd.f32 %v824_v15, %v707_v10  ;;  %vm923_vm8 = vmand %vm905_vm3, %vm3045_vm15  ;;  %v829_v29 = vadd.f32 %v823_v24, %v706_v54  ;;  %v989_v35 = vshll.u32 %v988_v63, 16 }
 0x35b   : > { %v1874_v32 = vsel %vm923_vm8, 1.0, %v2447_v8  ;;  %vm922_vm9 = vmand %vm904_vm1, %vm3041_vm14  ;;  %v1036_v60 = vrot.slane %v1028_v23, %v2775_v0  ;;  %v3105_v57 = vshll.u32 %v1003_v2, 16  ;;  %v1032_v11 = vrot.slane %v1028_v23, %v2768_v61 }
 0x35c   : > { %v767_v33 = vpop.xlane.xlu0 %766  ;;  %v941_v36 = vsel %vm3549_vm7, %v1874_v32, 0.0  ;;  %v1873_v37 = vsel %vm922_vm9, 1.0, %v2447_v8  ;;  %v902_v14 = vshll.u32 %v901_v5, 16  ;;  %v3111_v16 = vshll.u32 %v1018_v56, 16 }
 0x35d   : > { %v768_v38 = vcvt.f32.s32 %v767_v33  ;;  %v3073_v43 = vadd.f32 %v941_v36, %v830_v26  ;;  %v940_v46 = vsel %vm3549_vm7, %v1873_v37, 0.0  ;;  %vm3553_vm9 = vcmp.lt.s32.totalorder %v3094_v7, 128 }
 0x35e   : > { %v3077_v59 = vadd.f32 %v940_v46, %v829_v29  ;;  %vm3555_vm7 = vcmp.eq.s32.totalorder %v2979_v39, 3  ;;  %vm3121_vm11 = vcmp.eq.s32.totalorder %v1036_v60, 1 }
 0x35f   : > { %v771_v34 = vadd.s32 %v770_v27, %v768_v38 }
 0x361   : > { %vm790_vm12 = vcmp.eq.s32.totalorder %v2963_v30, %v771_v34  ;;  %vm789_vm1 = vcmp.eq.s32.totalorder %v2817_v28, %v771_v34  ;;  %v839_v10 = vsel %vm3552_vm6, %v771_v34, 0 }
 0x362   : > { %vm807_vm3 = vmand %vm789_vm1, %vm3013_vm4 }
 0x363   : > { %vm808_vm8 = vmand %vm790_vm12, %vm3017_vm5  ;;  %v1869_v17 = vsel %vm807_vm3, 1.0, %v2447_v8 }
 0x364   : > { %v884_v6 = vpop.xlane.xlu0 %883  ;;  %v1870_v51 = vsel %vm808_vm8, 1.0, %v2447_v8  ;;  %vm3129_vm8 = vcmp.eq.s32.totalorder %v1032_v11, 1  ;;  %v3138_v26 = vsel %vm3553_vm9, %v1869_v17, 0.0 }
 0x365   : > { %v885_v1 = vcvt.f32.s32 %v884_v6  ;;  %v826_v15 = vsel %vm3553_vm9, %v1870_v51, 0.0 }
 0x367   : > { %v888_v22 = vadd.s32 %v887_v53, %v885_v1 }
 0x368   : > { %v652_v18 = vpop.xlane.xlu0 %651  ;;  %v986_v19 = vpop.xlane.xlu1 %985 }
 0x369   : > { %vm906_vm10 = vcmp.eq.s32.totalorder %v2817_v28, %v888_v22  ;;  %vm907_vm12 = vcmp.eq.s32.totalorder %v2963_v30, %v888_v22  ;;  %v653_v0 = vcvt.f32.s32 %v652_v18  ;;  %v987_v61 = vcvt.f32.s32 %v986_v19 }
 0x36a   : > { %vm924_vm1 = vmand %vm906_vm10, %vm3041_vm14  ;;  %v956_v36 = vsel %vm3602_vm2, %v888_v22, 0  ;;  %vm3603_vm2 = vcmp.lt.s32.totalorder %v3094_v7, 128 }
 0x36b   : > { %vm925_vm3 = vmand %vm907_vm12, %vm3045_vm15  ;;  %v656_v48 = vadd.s32 %v655_v9, %v653_v0  ;;  %v990_v24 = vadd.s32 %v989_v35, %v987_v61  ;;  %v1875_v29 = vsel %vm924_vm1, 1.0, %v2447_v8 }
 0x36c   : > { %v637_v21 = vpop.xlane.xlu1 %636  ;;  %v1876_v33 = vsel %vm925_vm3, 1.0, %v2447_v8  ;;  %v3158_v34 = vsel %vm3603_vm2, %v1875_v29, 0.0  ;;  %vm3604_vm3 = vcmp.eq.s32.totalorder %v2979_v39, 0 }
 0x36d   : > { %vm665_vm12 = vcmp.eq.s32.totalorder %v2817_v28, %v656_v48  ;;  %vm666_vm6 = vcmp.eq.s32.totalorder %v2963_v30, %v656_v48  ;;  %v638_v32 = vcvt.f32.s32 %v637_v21  ;;  %v1072_v37 = vsel %vm3555_vm7, %v990_v24, 0 }
 0x36e   : > { %vm683_vm10 = vmand %vm665_vm12, %vm2981_vm13  ;;  %vm1022_vm9 = vcmp.eq.s32.totalorder %v2963_v30, %v990_v24  ;;  %vm1021_vm1 = vcmp.eq.s32.totalorder %v2817_v28, %v990_v24  ;;  %v1075_v38 = vadd.s32 %v1072_v37, %v3063_v25  ;;  %v723_v49 = vsel %vm3604_vm3, %v656_v48, 0 }
 0x36f   : > { %vm684_vm14 = vmand %vm666_vm6, %vm2990_vm0  ;;  %v1865_v27 = vsel %vm683_vm10, 1.0, %v2447_v8  ;;  %v641_v46 = vadd.s32 %v640_v12, %v638_v32  ;;  %vm3606_vm10 = vcmp.lt.s32.totalorder %v3109_v13, 128  ;;  %vm3607_vm7 = vcmask 31744  }
 0x370   : > { %v1866_v41 = vsel %vm684_vm14, 1.0, %v2447_v8  ;;  %v899_v47 = vpop.xlane.xlu0 %898  ;;  %v782_v55 = vpop.xlane.xlu1 %781  ;;  %vm1040_vm12 = vmand %vm1022_vm9, %vm3121_vm11  ;;  %v3169_v25 = vsel %vm3606_vm10, %v1865_v27, 0.0  ;;  %1079 = vst.msk [vmem:[%s2712_s30] sm:$0xff] %vm3607_vm7, %v1075_v38  ;;  %vm3608_vm10 = vcmp.lt.s32.totalorder %v3006_v52, 128 }
 0x371   : > { %vm3605_vm6 = vmmov %vm3603_vm2  ;;  %vm663_vm2 = vcmp.eq.s32.totalorder %v2817_v28, %v641_v46  ;;  %vm664_vm14 = vcmp.eq.s32.totalorder %v2963_v30, %v641_v46  ;;  %v722_v63 = vsel %vm3604_vm3, %v641_v46, 0  ;;  %v900_v2 = vcvt.f32.s32 %v899_v47 }
 0x372   : > { %v943_v31 = vsel %vm3605_vm6, %v1876_v33, 0.0  ;;  %vm1039_vm9 = vmand %vm1021_vm1, %vm3129_vm8  ;;  %v842_v23 = vadd.s32 %v839_v10, %v722_v63  ;;  %v783_v4 = vcvt.f32.s32 %v782_v55  ;;  %v1880_v5 = vsel %vm1040_vm12, 1.0, %v2447_v8 }
 0x373   : > { %vm681_vm6 = vmand %vm663_vm2, %vm2981_vm13  ;;  %v1879_v56 = vsel %vm1039_vm9, 1.0, %v2447_v8  ;;  %v903_v53 = vadd.s32 %v902_v14, %v900_v2  ;;  %v1058_v1 = vsel %vm3608_vm10, %v1880_v5, 0.0  ;;  %vm3610_vm12 = vcmp.eq.s32.totalorder %v2979_v39, 2 }
 0x374   : > { %vm682_vm7 = vmand %vm664_vm14, %vm2990_vm0  ;;  %v1863_v6 = vsel %vm681_vm6, 1.0, %v2447_v8  ;;  %v786_v9 = vadd.s32 %v3096_v50, %v783_v4  ;;  %v3195_v35 = vadd.f32 %v1058_v1, %v3073_v43  ;;  %v1016_v45 = vpop.xlane.xlu0 %1015  ;;  %v1001_v22 = vpop.xlane.xlu1 %1000  ;;  %vm3611_vm3 = vcmp.eq.s32.totalorder %v2979_v39, 1 }
 0x375   : > { %vm3609_vm1 = vmmov %vm3608_vm10  ;;  %v1864_v40 = vsel %vm682_vm7, 1.0, %v2447_v8  ;;  %vm908_vm13 = vcmp.eq.s32.totalorder %v2817_v28, %v903_v53  ;;  %vm909_vm0 = vcmp.eq.s32.totalorder %v2963_v30, %v903_v53  ;;  %v957_v52 = vsel %vm3610_vm12, %v903_v53, 0 }
 0x376   : > { %v1057_v12 = vsel %vm3609_vm1, %v1879_v56, 0.0  ;;  %v1017_v11 = vcvt.f32.s32 %v1016_v45  ;;  %vm791_vm2 = vcmp.eq.s32.totalorder %v2817_v28, %v786_v9  ;;  %vm792_vm14 = vcmp.eq.s32.totalorder %v2963_v30, %v786_v9  ;;  %1168 = vxpose.xlu0.b32.start [1/3] (short) %v3195_v35, 128  ;;  %vm927_vm9 = vmand %vm909_vm0, %vm3045_vm15 }
 0x377   : > { %v3198_v60 = vadd.f32 %v1057_v12, %v3077_v59  ;;  %v840_v43 = vsel %vm3611_vm3, %v786_v9, 0  ;;  %v959_v59 = vadd.s32 %v956_v36, %v842_v23  ;;  %v1002_v17 = vcvt.f32.s32 %v1001_v22  ;;  %vm809_vm7 = vmand %vm791_vm2, %vm3013_vm4 }
 0x378   : > { %v843_v50 = vadd.s32 %v840_v43, %v723_v49  ;;  %v1020_v14 = vadd.s32 %v3111_v16, %v1017_v11  ;;  %vm3612_vm6 = vcmp.lt.s32.totalorder %v3094_v7, 128  ;;  %vm3614_vm1 = vcmp.lt.s32.totalorder %v3109_v13, 128  ;;  %vm810_vm15 = vmand %vm792_vm14, %vm3017_vm5 }
 0x379   : > { %1136 = vxpose.xlu1.b32.start [1/3] (short) %v3198_v60, 128  ;;  %v709_v18 = vsel %vm3612_vm6, %v1864_v40, 0.0  ;;  %vm3613_vm10 = vmmov %vm3612_vm6  ;;  %v711_v0 = vsel %vm3614_vm1, %v1866_v41, 0.0  ;;  %v1878_v20 = vsel %vm927_vm9, 1.0, %v2447_v8  ;;  %v1871_v16 = vsel %vm809_vm7, 1.0, %v2447_v8 }
 0x37a   : > { %v832_v19 = vadd.f32 %v826_v15, %v709_v18  ;;  %v708_v51 = vsel %vm3613_vm10, %v1863_v6, 0.0  ;;  %v960_v61 = vadd.s32 %v957_v52, %v843_v50  ;;  %vm1025_vm0 = vcmp.eq.s32.totalorder %v2817_v28, %v1020_v14  ;;  %vm3619_vm3 = vmmov %vm3614_vm1 }
 0x37b   : > { %vm1026_vm4 = vcmp.eq.s32.totalorder %v2963_v30, %v1020_v14  ;;  %v1872_v58 = vsel %vm810_vm15, 1.0, %v2447_v8  ;;  %vm3615_vm12 = vcmp.eq.s32.totalorder %v2979_v39, 3  ;;  %v1005_v48 = vadd.s32 %v3105_v57, %v1002_v17  ;;  %vm3620_vm9 = vmmov %vm3614_vm1 }
 0x37c   : > { %v1074_v10 = vsel %vm3615_vm12, %v1020_v14, 0  ;;  %v949_v24 = vadd.f32 %v943_v31, %v832_v19  ;;  %vm1044_vm2 = vmand %vm1026_vm4, %vm3121_vm11  ;;  %vm3616_vm5 = vnez %v3595_v3  ;;  %v831_v15 = vadd.f32 %v3138_v26, %v708_v51 }
 0x37d   : > { %vm3239_vm14 = vmand %vm908_vm13, %vm3616_vm5  ;;  %v1077_v21 = vadd.s32 %v1074_v10, %v960_v61  ;;  %v828_v29 = vsel %vm3619_vm3, %v1872_v58, 0.0  ;;  %v945_v57 = vsel %vm3620_vm9, %v1878_v20, 0.0  ;;  %vm1023_vm6 = vcmp.eq.s32.totalorder %v2817_v28, %v1005_v48 }
 0x37e   : > { %vm1024_vm7 = vcmp.eq.s32.totalorder %v2963_v30, %v1005_v48  ;;  %vm3621_vm10 = vmmov %vm3615_vm12  ;;  %v834_v32 = vadd.f32 %v828_v29, %v711_v0  ;;  %vm3624_vm1 = vcmask 31744   ;;  %v948_v30 = vadd.f32 %v3158_v34, %v831_v15 }
 0x37f   : > { %v1073_v3 = vsel %vm3621_vm10, %v1005_v48, 0  ;;  %vm3256_vm13 = vmand %vm1025_vm0, %vm3129_vm8  ;;  %1081 = vst.msk [vmem:[%s2712_s30 + $0x10] sm:$0xff] %vm3624_vm1, %v1077_v21  ;;  %v1884_v39 = vsel %vm1044_vm2, 1.0, %v2447_v8  ;;  %v1877_v34 = vsel %vm3239_vm14, 1.0, %v2447_v8  ;;  %vm1200_vm14 = vcmask 195584  }
 0x380   : > { %v1076_v33 = vadd.s32 %v1073_v3, %v959_v59  ;;  %vm1042_vm15 = vmand %vm1024_vm7, %vm3121_vm11  ;;  %v951_v28 = vadd.f32 %v945_v57, %v834_v32  ;;  %vm3628_vm11 = vcmp.lt.s32.totalorder %v3094_v7, 128  ;;  %v1883_v54 = vsel %vm3256_vm13, 1.0, %v2447_v8 }
 0x381   : > { %vm3625_vm4 = vmmov %vm3619_vm3  ;;  %v1882_v37 = vsel %vm1042_vm15, 1.0, %v2447_v8 }
 0x382   : > { %v827_v36 = vsel %vm3625_vm4, %v1871_v16, 0.0  ;;  %vm1041_vm0 = vmand %vm1023_vm6, %vm3129_vm8  ;;  %v1060_v44 = vsel %vm3628_vm11, %v1882_v37, 0.0 }
 0x383   : > { %vm3626_vm12 = vmmov %vm3619_vm3  ;;  %v833_v38 = vadd.f32 %v827_v36, %v3169_v25  ;;  %v1881_v46 = vsel %vm1041_vm0, 1.0, %v2447_v8  ;;  %v1066_v41 = vadd.f32 %v1060_v44, %v949_v24 }
 0x384   : > { %v1062_v27 = vsel %vm3626_vm12, %v1884_v39, 0.0  ;;  %vm3627_vm5 = vmmov %vm3624_vm1 }
 0x385   : > { %1080 = vst.msk [vmem:[%s2712_s30 + $0x8] sm:$0xff] %vm3627_vm5, %v1076_v33  ;;  %vm3629_vm8 = vmmov %vm3628_vm11  ;;  %v1068_v47 = vadd.f32 %v1062_v27, %v951_v28  ;;  %1169 = vxpose.xlu0.b32.cont [2/3] (short) %v1066_v41, 128  ;;  %v1092_v2 = vadd.f32 %v1066_v41, %v3195_v35  ;;  %v1083_v35 = vld [vmem:[%s2714_s27 + $0x8] sm:$0xff] }
 0x386   : > { %v1059_v49 = vsel %vm3629_vm8, %v1881_v46, 0.0  ;;  %vm3630_vm2 = vmmov %vm3619_vm3  ;;  %v1592_v46 = vrot.slane %v2760_v42, 4 }
 0x387   : > { %v944_v55 = vsel %vm3630_vm2, %v1877_v34, 0.0  ;;  %v1065_v31 = vadd.f32 %v1059_v49, %v948_v30  ;;  %vm3631_vm3 = vmmov %vm3630_vm2  ;;  %v1093_v7 = vadd.f32 %v1092_v2, %v1068_v47 }
 0x388   : > { %v950_v25 = vadd.f32 %v944_v55, %v833_v38  ;;  %v1061_v63 = vsel %vm3631_vm3, %v1883_v54, 0.0  ;;  %v1593_v34 = vadd.f32 %v1592_v46, %v2760_v42 }
 0x389   : > { %1137 = vxpose.xlu1.b32.cont [2/3] (short) %v1065_v31, 128  ;;  %v1084_v8 = vadd.f32 %v1065_v31, %v3198_v60  ;;  %1170 = vxpose.xlu0.b32.end [3/3] (short) %v1068_v47, 128  ;;  %v1094_v5 = vrot.slane %v1093_v7, 4  ;;  %v1082_v60 = vld [vmem:[%s2714_s27] sm:$0xff] }
 0x38a   : > { %v1067_v23 = vadd.f32 %v1061_v63, %v950_v25  ;;  %v1594_v54 = vrot.slane %v1593_v34, 2  ;;  %v1586_v47 = vld [vmem:[%s2718_s4] sm:$0xff] }
 0x38b   : > { %v1095_v6 = vadd.f32 %v1094_v5, %v1093_v7 }
 0x38c   : > { %v1085_v4 = vadd.f32 %v1084_v8, %v1067_v23  ;;  %v1595_v41 = vadd.f32 %v1594_v54, %v1593_v34 }
 0x38d   : > { %1138 = vxpose.xlu1.b32.end [3/3] (short) %v1067_v23, 128  ;;  %v1096_v53 = vrot.slane %v1095_v6, 2 }
 0x38e   : > { %v1086_v56 = vrot.slane %v1085_v4, 4  ;;  %v1596_v49 = vrot.slane %v1595_v41, 1 }
 0x38f   : > { %v1097_v12 = vadd.f32 %v1096_v53, %v1095_v6 }
 0x390   : > { %v1087_v13 = vadd.f32 %v1086_v56, %v1085_v4  ;;  %v1597_v55 = vadd.f32 %v1596_v49, %v1595_v41 }
 0x391   : > { %v1098_v9 = vrot.slane %v1097_v12, 1 }
 0x392   : > { %v1088_v1 = vrot.slane %v1087_v13, 2  ;;  %v1598_v31 = vadd.f32 %v1597_v55, %v1586_v47 }
 0x393   : > { %v1099_v22 = vadd.f32 %v1098_v9, %v1097_v12 }
 0x394   : > { %v1089_v40 = vadd.f32 %v1088_v1, %v1087_v13  ;;  %1599 = vst [vmem:[%s2718_s4] sm:$0xff] %v1598_v31 }
 0x395   : > { %v1101_v11 = vadd.f32 %v1099_v22, %v1083_v35 }
 0x396   : > { %v1090_v45 = vrot.slane %v1089_v40, 1 }
 0x397   : > { %1103 = vst [vmem:[%s2714_s27 + $0x8] sm:$0xff] %v1101_v11 }
 0x398   : > { %v1091_v52 = vadd.f32 %v1090_v45, %v1089_v40 }
 0x39a   : > { %v1100_v43 = vadd.f32 %v1091_v52, %v1082_v60 }
 0x39c   : > { %1102 = vst [vmem:[%s2714_s27] sm:$0xff] %v1100_v43 }
 0x401   : > { %v1184_v50 = vpop.trf.xlu0 }
 0x405   : > { %v1152_v59 = vpop.trf.xlu1  ;;  %v1185_v17 = vpop.trf.xlu0 }
 0x406   : > { %1971 = vmatprep.mubr.msk.f32.mxu0 %vm1200_vm14, %v1152_v59 }
 0x409   : > { %v1153_v14 = vpop.trf.xlu1  ;;  %v1186_v51 = vpop.trf.xlu0 }
 0x40a   : > { %1972 = vmatmul.mubr.msk.f32.vlgmr.msra.gmra.mrb[6].mxu0 %vm1200_vm14, %v1153_v14 }
 0x40d   : > { %v1154_v18 = vpop.trf.xlu1  ;;  %v1187_v20 = vpop.trf.xlu0 }
 0x40e   : > { %1974 = vmatprep.mubr.msk.f32.mxu0 %vm1200_vm14, %v1154_v18 }
 0x411   : > { %v1155_v19 = vpop.trf.xlu1  ;;  %v1188_v58 = vpop.trf.xlu0 }
 0x412   : > { %1975 = vmatmul.mubr.msk.f32.gmra.mrb[8].mxu0 %vm1200_vm14, %v1155_v19 }
 0x415   : > { %v1156_v0 = vpop.trf.xlu1  ;;  %v1189_v48 = vpop.trf.xlu0 }
 0x416   : > { %1977 = vmatprep.mubr.msk.f32.mxu0 %vm1200_vm14, %v1156_v0 }
 0x419   : > { %v1157_v16 = vpop.trf.xlu1  ;;  %v1190_v21 = vpop.trf.xlu0 }
 0x41a   : > { %1978 = vmatmul.mubr.msk.f32.gmra.mrb[10].mxu0 %vm1200_vm14, %v1157_v16 }
 0x41d   : > { %v1158_v61 = vpop.trf.xlu1  ;;  %v1191_v29 = vpop.trf.xlu0 }
 0x41e   : > { %1980 = vmatprep.mubr.msk.f32.mxu1 %vm1200_vm14, %v1158_v61 }
 0x421   : > { %v1159_v10 = vpop.trf.xlu1  ;;  %v1192_v32 = vpop.trf.xlu0 }
 0x422   : > { %1981 = vmatmul.mubr.msk.f32.vlgmr.msra.gmra.mrb[0].mxu1 %vm1200_vm14, %v1159_v10 }
 0x425   : > { %v1160_v24 = vpop.trf.xlu1  ;;  %v1193_v33 = vpop.trf.xlu0 }
 0x426   : > { %1983 = vmatprep.mubr.msk.f32.mxu1 %vm1200_vm14, %v1160_v24 }
 0x429   : > { %v1161_v62 = vpop.trf.xlu1  ;;  %v1194_v36 = vpop.trf.xlu0 }
 0x42a   : > { %1984 = vmatmul.mubr.msk.f32.gmra.mrb[2].mxu1 %vm1200_vm14, %v1161_v62 }
 0x42d   : > { %v1162_v15 = vpop.trf.xlu1  ;;  %v1195_v37 = vpop.trf.xlu0 }
 0x42e   : > { %1986 = vmatprep.mubr.msk.f32.mxu1 %vm1200_vm14, %v1162_v15 }
 0x431   : > { %v1163_v57 = vpop.trf.xlu1  ;;  %v1196_v28 = vpop.trf.xlu0 }
 0x432   : > { %1987 = vmatmul.mubr.msk.f32.gmra.mrb[4].mxu1 %vm1200_vm14, %v1163_v57 }
 0x435   : > { %v1164_v3 = vpop.trf.xlu1  ;;  %v1197_v27 = vpop.trf.xlu0 }
 0x436   : > { %1989 = vmatprep.mubr.msk.f32.mxu1 %vm1200_vm14, %v1164_v3 }
 0x439   : > { %v1165_v26 = vpop.trf.xlu1  ;;  %v1198_v38 = vpop.trf.xlu0 }
 0x43a   : > { %1990 = vmatmul.mubr.msk.f32.gmra.mrb[6].mxu1 %vm1200_vm14, %v1165_v26 }
 0x43d   : > { %v1166_v30 = vpop.trf.xlu1  ;;  %v1199_v44 = vpop.trf.xlu0 }
 0x43e   : > { %1992 = vmatprep.mubr.msk.f32.mxu1 %vm1200_vm14, %v1166_v30 }
 0x441   : > { %v1167_v39 = vpop.trf.xlu1 }
 0x442   : > { %1993 = vmatmul.mubr.msk.f32.gmra.mrb[8].mxu1 %vm1200_vm14, %v1167_v39 }
 0x443   : > { %1995 = vmatprep.mubr.msk.f32.mxu1 %vm1200_vm14, %v1184_v50 }
 0x446   : > { %1996 = vmatmul.mubr.msk.f32.gmra.mrb[10].mxu1 %vm1200_vm14, %v1185_v17 }
 0x447   : > { %1998 = vmatprep.mubr.msk.f32.mxu1 %vm1200_vm14, %v1186_v51 }
 0x44a   : > { %1999 = vmatmul.mubr.msk.f32.gmra.mrb[12].mxu1 %vm1200_vm14, %v1187_v20 }
 0x44b   : > { %2001 = vmatprep.mubr.msk.f32.mxu1 %vm1200_vm14, %v1188_v58 }
 0x44e   : > { %2002 = vmatmul.mubr.msk.f32.gmra.mrb[14].mxu1 %vm1200_vm14, %v1189_v48 }
 0x44f   : > { %2004 = vmatprep.mubr.msk.f32.mxu1 %vm1200_vm14, %v1190_v21 }
 0x452   : > { %2005 = vmatmul.mubr.msk.f32.gmra.mrb[16].mxu1 %vm1200_vm14, %v1191_v29 }
 0x453   : > { %2007 = vmatprep.mubr.msk.f32.mxu1 %vm1200_vm14, %v1192_v32 }
 0x456   : > { %2008 = vmatmul.mubr.msk.f32.gmra.mrb[18].mxu1 %vm1200_vm14, %v1193_v33 }
 0x457   : > { %2010 = vmatprep.mubr.msk.f32.mxu1 %vm1200_vm14, %v1194_v36 }
 0x45a   : > { %2011 = vmatmul.mubr.msk.f32.gmra.mrb[20].mxu1 %vm1200_vm14, %v1195_v37 }
 0x45b   : > { %2013 = vmatprep.mubr.msk.f32.mxu1 %vm1200_vm14, %v1196_v28 }
 0x45e   : > { %2014 = vmatmul.mubr.msk.f32.gmra.mrb[22].mxu1 %vm1200_vm14, %v1197_v27 }
 0x45f   : > { %2016 = vmatprep.mubr.msk.f32.mxu1 %vm1200_vm14, %v1198_v38 }
 0x462   : > { %2017 = vmatmul.mubr.msk.f32.gmra.mrb[24].mxu1 %vm1200_vm14, %v1199_v44 }
 0x463   : > { %2265 = shalt.err (!%p2262_p1)
}
 0x464   : > { %s2266_s20 = scalar_lea.hbm %s3336_s24, 256  ;;  %s2270_s8 = scalar_lea.hbm %s3634_s23, 512 }
 0x465   : > { %p2267_p6 = scmp.ne.s32.totalorder %s3336_s24, %s2266_s20  ;;  %p2271_p4 = scmp.lt.u32.totalorder %s3336_s24, %s3634_s23 }
 0x466   : > { %p2272_p7 = scmp.lt.u32.totalorder %s2270_s8, %s2266_s20  ;;  %p2274_p11 = scmp.lt.u32.totalorder %s2266_s20, %s3336_s24 }
 0x467   : > { %p2268_p10 = pnand %p2267_p6, %p3635_p13 }
 0x468   : > { %p2273_p9 = por %p2272_p7, %p2271_p4 }
 0x469   : > { %p2269_p3 = pneg %p2268_p10 }
 0x46a   : > { %p2275_p0 = por %p2274_p11, %p2273_p9 }
 0x46c   : > { %p2276_p2 = pnand %p2275_p0, %p2269_p3 }
 0x46e   : > { %2279 = shalt.err (!%p2276_p2)
}
 0x46f   : > { %2067 = dma.vmem_to_hbm [thread:$0]  (%p3635_p13), %s1639_s22, 256, %s3336_s24, %s1608_s26   ;;  %v1105_v42 = vld [vmem:[%s2716_s7 + $0x8] sm:$0xff]  ;;  %v1104_v25 = vld [vmem:[%s2716_s7] sm:$0xff]  ;;  %v1107_v7 = vld [vmem:[%s2716_s7 + $0x18] sm:$0xff] }
 0x470   : > { %v1106_v4 = vld [vmem:[%s2716_s7 + $0x10] sm:$0xff]  ;;  %v1109_v53 = vld [vmem:[%s2716_s7 + $0x28] sm:$0xff]  ;;  %v1108_v1 = vld [vmem:[%s2716_s7 + $0x20] sm:$0xff]  ;;  %s1612_s13 = sand.u32 1, %s2554_s16   ;;  %s1929_s24 = sshll.u32 %s2426_s12, 12 }
 0x471   : > { %v1111_v45 = vld [vmem:[%s2716_s7 + $0x38] sm:$0xff]  ;;  %v1110_v60 = vld [vmem:[%s2716_s7 + $0x30] sm:$0xff]  ;;  %v1113_v59 = vld [vmem:[%s2716_s7 + $0x48] sm:$0xff]  ;;  %s1651_s22 = sshll.u32 %s2716_s7, 4  ;;  %s1924_s26 = sshll.u32 %s2426_s12, 7  ;;  %s3430_s22 = int_to_ptr.vmem [resolvable:$true] %s1651_s22 }
 0x472   : > { %v1112_v50 = vld [vmem:[%s2716_s7 + $0x40] sm:$0xff]  ;;  %v1115_v51 = vld [vmem:[%s2716_s7 + $0x58] sm:$0xff]  ;;  %v1114_v0 = vld [vmem:[%s2716_s7 + $0x50] sm:$0xff]  ;;  %s1667_s1 = sshll.u32 %s2718_s4, 4  ;;  %s3636_s16 = sld [smem:[#allocation25_spill]]  ;;  %s3438_s1 = int_to_ptr.vmem [resolvable:$true] %s1667_s1 }
 0x473   : > { %v1117_v10 = vld [vmem:[%s2716_s7 + $0x68] sm:$0xff]  ;;  %v1116_v48 = vld [vmem:[%s2716_s7 + $0x60] sm:$0xff]  ;;  %v1119_v29 = vld [vmem:[%s2716_s7 + $0x78] sm:$0xff]  ;;  %s3637_s17 = sld [smem:[#allocation26_spill]]  ;;  %s3441_s12 = scalar_lea.sflag [#allocation9], %s1612_s13 }
 0x474   : > { %v1118_v57 = vld [vmem:[%s2716_s7 + $0x70] sm:$0xff]  ;;  %v1121_v30 = vld [vmem:[%s2716_s7 + $0x88] sm:$0xff]  ;;  %v1120_v39 = vld [vmem:[%s2716_s7 + $0x80] sm:$0xff]  ;;  %s2280_s4 = scalar_lea.vmem %s3430_s22, 4096  ;;  %s2451_s30 = smov [#allocation8]  }
 0x475   : > { %v1123_v38 = vld [vmem:[%s2716_s7 + $0x98] sm:$0xff]  ;;  %v1122_v44 = vld [vmem:[%s2716_s7 + $0x90] sm:$0xff]  ;;  %v1125_v49 = vld [vmem:[%s2716_s7 + $0xa8] sm:$0xff]  ;;  %p2281_p5 = scmp.ne.s32.totalorder %s3430_s22, %s2280_s4  ;;  %s2284_s11 = sshll.u32 %s2451_s30, 4  ;;  %s2285_s11 = int_to_ptr.vmem [resolvable:$false] %s2284_s11 }
 0x476   : > { %v1124_v47 = vld [vmem:[%s2716_s7 + $0xa0] sm:$0xff]  ;;  %p2287_p1 = scmp.lt.s32.totalorder %s3430_s22, %s2285_s11 }
 0x477   : > { %p2282_p8 = pnand %p2281_p5, %p3635_p13 }
 0x478   : > { %s3428_s25 = scalar_lea.hbm %s3636_s16, %s1929_s24  ;;  %s2286_s24 = scalar_lea.vmem %s2285_s11, 8192 }
 0x479   : > { %s3436_s8 = scalar_lea.hbm %s3637_s17, %s1924_s26  ;;  %p2283_p12 = pneg %p2282_p8 }
 0x47a   : > { %p2288_p6 = scmp.lt.s32.totalorder %s2286_s24, %s2280_s4 }
 0x47c   : > { %p2289_p10 = por %p2288_p6, %p2287_p1 }
 0x47e   : > { %p2290_p3 = pnand %p2289_p10, %p2283_p12 }
 0x4dd   : > { %v1973_v63 = vpop.f32.mrb[6].mxu0 }
 0x4de   : > { %v1523_v2 = vadd.f32 %v1973_v63, %v1105_v42  ;;  %v1363_v8 = vpop.f32.mrb[7].mxu0  ;;  %v1127_v63 = vld [vmem:[%s2716_s7 + $0xb8] sm:$0xff] }
 0x4df   : > { %v1522_v23 = vadd.f32 %v1363_v8, %v1104_v25 }
 0x4e0   : > { %1555 = vst [vmem:[%s2716_s7 + $0x8] sm:$0xff] %v1523_v2  ;;  %v1126_v2 = vld [vmem:[%s2716_s7 + $0xb0] sm:$0xff] }
 0x4e1   : > { %1554 = vst [vmem:[%s2716_s7] sm:$0xff] %v1522_v23 }
 0x4e5   : > { %v1976_v5 = vpop.f32.mrb[8].mxu0 }
 0x4e6   : > { %v1525_v56 = vadd.f32 %v1976_v5, %v1107_v7  ;;  %v1373_v6 = vpop.f32.mrb[9].mxu0  ;;  %v1129_v5 = vld [vmem:[%s2716_s7 + $0xc8] sm:$0xff] }
 0x4e7   : > { %v1524_v13 = vadd.f32 %v1373_v6, %v1106_v4 }
 0x4e8   : > { %1557 = vst [vmem:[%s2716_s7 + $0x18] sm:$0xff] %v1525_v56  ;;  %v1128_v56 = vld [vmem:[%s2716_s7 + $0xc0] sm:$0xff] }
 0x4e9   : > { %1556 = vst [vmem:[%s2716_s7 + $0x10] sm:$0xff] %v1524_v13 }
 0x4ed   : > { %v1979_v12 = vpop.f32.mrb[10].mxu0 }
 0x4ee   : > { %v1527_v40 = vadd.f32 %v1979_v12, %v1109_v53  ;;  %v1383_v9 = vpop.f32.mrb[11].mxu0  ;;  %v1131_v12 = vld [vmem:[%s2716_s7 + $0xd8] sm:$0xff] }
 0x4ef   : > { %v1526_v35 = vadd.f32 %v1383_v9, %v1108_v1 }
 0x4f0   : > { %1559 = vst [vmem:[%s2716_s7 + $0x28] sm:$0xff] %v1527_v40  ;;  %v1130_v40 = vld [vmem:[%s2716_s7 + $0xd0] sm:$0xff] }
 0x4f1   : > { %1558 = vst [vmem:[%s2716_s7 + $0x20] sm:$0xff] %v1526_v35 }
 0x4f5   : > { %v1982_v22 = vpop.f32.mrb[0].mxu1 }
 0x4f6   : > { %v1529_v52 = vadd.f32 %v1982_v22, %v1111_v45  ;;  %v1393_v11 = vpop.f32.mrb[1].mxu1  ;;  %v1133_v22 = vld [vmem:[%s2716_s7 + $0xe8] sm:$0xff] }
 0x4f7   : > { %v1528_v43 = vadd.f32 %v1393_v11, %v1110_v60 }
 0x4f8   : > { %1561 = vst [vmem:[%s2716_s7 + $0x38] sm:$0xff] %v1529_v52  ;;  %v1132_v52 = vld [vmem:[%s2716_s7 + $0xe0] sm:$0xff] }
 0x4f9   : > { %1560 = vst [vmem:[%s2716_s7 + $0x30] sm:$0xff] %v1528_v43 }
 0x4fd   : > { %v1985_v14 = vpop.f32.mrb[2].mxu1 }
 0x4fe   : > { %v1531_v17 = vadd.f32 %v1985_v14, %v1113_v59  ;;  %v1403_v18 = vpop.f32.mrb[3].mxu1  ;;  %v1135_v14 = vld [vmem:[%s2716_s7 + $0xf8] sm:$0xff] }
 0x4ff   : > { %v1530_v19 = vadd.f32 %v1403_v18, %v1112_v50 }
 0x500   : > { %1563 = vst [vmem:[%s2716_s7 + $0x48] sm:$0xff] %v1531_v17  ;;  %v1134_v17 = vld [vmem:[%s2716_s7 + $0xf0] sm:$0xff] }
 0x501   : > { %1562 = vst [vmem:[%s2716_s7 + $0x40] sm:$0xff] %v1530_v19 }
 0x505   : > { %v1988_v20 = vpop.f32.mrb[4].mxu1 }
 0x506   : > { %v1533_v16 = vadd.f32 %v1988_v20, %v1115_v51  ;;  %v1413_v61 = vpop.f32.mrb[5].mxu1 }
 0x507   : > { %v1532_v58 = vadd.f32 %v1413_v61, %v1114_v0 }
 0x508   : > { %1565 = vst [vmem:[%s2716_s7 + $0x58] sm:$0xff] %v1533_v16 }
 0x509   : > { %1564 = vst [vmem:[%s2716_s7 + $0x50] sm:$0xff] %v1532_v58 }
 0x50d   : > { %v1991_v24 = vpop.f32.mrb[6].mxu1 }
 0x50e   : > { %v1535_v62 = vadd.f32 %v1991_v24, %v1117_v10  ;;  %v1423_v21 = vpop.f32.mrb[7].mxu1 }
 0x50f   : > { %v1534_v15 = vadd.f32 %v1423_v21, %v1116_v48 }
 0x510   : > { %1567 = vst [vmem:[%s2716_s7 + $0x68] sm:$0xff] %v1535_v62 }
 0x511   : > { %1566 = vst [vmem:[%s2716_s7 + $0x60] sm:$0xff] %v1534_v15 }
 0x515   : > { %v1994_v3 = vpop.f32.mrb[8].mxu1 }
 0x516   : > { %v1537_v32 = vadd.f32 %v1994_v3, %v1119_v29  ;;  %v1433_v26 = vpop.f32.mrb[9].mxu1 }
 0x517   : > { %v1536_v33 = vadd.f32 %v1433_v26, %v1118_v57 }
 0x518   : > { %1569 = vst [vmem:[%s2716_s7 + $0x78] sm:$0xff] %v1537_v32 }
 0x519   : > { %1568 = vst [vmem:[%s2716_s7 + $0x70] sm:$0xff] %v1536_v33  ;;  %v1997_v36 = vpop.f32.mrb[10].mxu1 }
 0x51a   : > { %v1539_v37 = vadd.f32 %v1997_v36, %v1121_v30  ;;  %v1443_v28 = vpop.f32.mrb[11].mxu1 }
 0x51b   : > { %v1538_v27 = vadd.f32 %v1443_v28, %v1120_v39 }
 0x51c   : > { %1571 = vst [vmem:[%s2716_s7 + $0x88] sm:$0xff] %v1539_v37 }
 0x51d   : > { %1570 = vst [vmem:[%s2716_s7 + $0x80] sm:$0xff] %v1538_v27  ;;  %v2000_v46 = vpop.f32.mrb[12].mxu1 }
 0x51e   : > { %v1541_v34 = vadd.f32 %v2000_v46, %v1123_v38  ;;  %v1453_v54 = vpop.f32.mrb[13].mxu1 }
 0x51f   : > { %v1540_v41 = vadd.f32 %v1453_v54, %v1122_v44 }
 0x520   : > { %1573 = vst [vmem:[%s2716_s7 + $0x98] sm:$0xff] %v1541_v34 }
 0x521   : > { %1572 = vst [vmem:[%s2716_s7 + $0x90] sm:$0xff] %v1540_v41  ;;  %v2003_v55 = vpop.f32.mrb[14].mxu1 }
 0x522   : > { %v1543_v31 = vadd.f32 %v2003_v55, %v1125_v49  ;;  %v1463_v42 = vpop.f32.mrb[15].mxu1 }
 0x523   : > { %v1542_v25 = vadd.f32 %v1463_v42, %v1124_v47 }
 0x524   : > { %1575 = vst [vmem:[%s2716_s7 + $0xa8] sm:$0xff] %v1543_v31 }
 0x525   : > { %1574 = vst [vmem:[%s2716_s7 + $0xa0] sm:$0xff] %v1542_v25  ;;  %v2006_v8 = vpop.f32.mrb[16].mxu1 }
 0x526   : > { %v1545_v23 = vadd.f32 %v2006_v8, %v1127_v63  ;;  %v1473_v7 = vpop.f32.mrb[17].mxu1 }
 0x527   : > { %v1544_v4 = vadd.f32 %v1473_v7, %v1126_v2 }
 0x528   : > { %1577 = vst [vmem:[%s2716_s7 + $0xb8] sm:$0xff] %v1545_v23 }
 0x529   : > { %1576 = vst [vmem:[%s2716_s7 + $0xb0] sm:$0xff] %v1544_v4  ;;  %v2009_v6 = vpop.f32.mrb[18].mxu1 }
 0x52a   : > { %v1547_v13 = vadd.f32 %v2009_v6, %v1129_v5  ;;  %v1483_v53 = vpop.f32.mrb[19].mxu1 }
 0x52b   : > { %v1546_v1 = vadd.f32 %v1483_v53, %v1128_v56 }
 0x52c   : > { %1579 = vst [vmem:[%s2716_s7 + $0xc8] sm:$0xff] %v1547_v13 }
 0x52d   : > { %1578 = vst [vmem:[%s2716_s7 + $0xc0] sm:$0xff] %v1546_v1  ;;  %v2012_v9 = vpop.f32.mrb[20].mxu1 }
 0x52e   : > { %v1549_v35 = vadd.f32 %v2012_v9, %v1131_v12  ;;  %v1493_v45 = vpop.f32.mrb[21].mxu1 }
 0x52f   : > { %v1548_v60 = vadd.f32 %v1493_v45, %v1130_v40 }
 0x530   : > { %1581 = vst [vmem:[%s2716_s7 + $0xd8] sm:$0xff] %v1549_v35 }
 0x531   : > { %1580 = vst [vmem:[%s2716_s7 + $0xd0] sm:$0xff] %v1548_v60  ;;  %v2015_v11 = vpop.f32.mrb[22].mxu1 }
 0x532   : > { %v1551_v43 = vadd.f32 %v2015_v11, %v1133_v22  ;;  %v1503_v59 = vpop.f32.mrb[23].mxu1 }
 0x533   : > { %v1550_v50 = vadd.f32 %v1503_v59, %v1132_v52 }
 0x534   : > { %1583 = vst [vmem:[%s2716_s7 + $0xe8] sm:$0xff] %v1551_v43 }
 0x535   : > { %1582 = vst [vmem:[%s2716_s7 + $0xe0] sm:$0xff] %v1550_v50  ;;  %v2018_v18 = vpop.f32.mrb[24].mxu1 }
 0x536   : > { %v1553_v19 = vadd.f32 %v2018_v18, %v1135_v14  ;;  %v1513_v51 = vpop.f32.mrb[25].mxu1 }
 0x537   : > { %v1552_v0 = vadd.f32 %v1513_v51, %v1134_v17 }
 0x538   : > { %1585 = vst [vmem:[%s2716_s7 + $0xf8] sm:$0xff] %v1553_v19 }
 0x539   : > { %1584 = vst [vmem:[%s2716_s7 + $0xf0] sm:$0xff] %v1552_v0 }
 0x53a   : > { %2293 = shalt.err (!%p2290_p3)
}
 0x53b   : > { %s2294_s7 = scalar_lea.hbm %s3428_s25, 4096  ;;  %s2298_s6 = scalar_lea.hbm %s3636_s16, 8192 }
 0x53c   : > { %p2295_p4 = scmp.ne.s32.totalorder %s3428_s25, %s2294_s7  ;;  %p2299_p11 = scmp.lt.u32.totalorder %s3428_s25, %s3636_s16 }
 0x53d   : > { %p2300_p0 = scmp.lt.u32.totalorder %s2298_s6, %s2294_s7  ;;  %p2302_p5 = scmp.lt.u32.totalorder %s2294_s7, %s3428_s25 }
 0x53e   : > { %p2296_p7 = pnand %p2295_p4, %p3635_p13 }
 0x53f   : > { %p2301_p2 = por %p2300_p0, %p2299_p11 }
 0x540   : > { %p2297_p9 = pneg %p2296_p7 }
 0x541   : > { %p2303_p8 = por %p2302_p5, %p2301_p2 }
 0x543   : > { %p2304_p12 = pnand %p2303_p8, %p2297_p9 }
 0x545   : > { %2307 = shalt.err (!%p2304_p12)
}
 0x546   : > { %s2452_s27 = smov 128   ;;  %s2453_s4 = smov 8  }
 0x547   : > { %2068 = dma.vmem_to_hbm [thread:$0]  (%p3635_p13), %s3430_s22, 4096, %s3428_s25, %s3441_s12, %s2452_s27, %s2452_s27, %s2453_s4  }
 0x548   : > { %s2308_s30 = scalar_lea.vmem %s3438_s1, 128  ;;  %s2454_s11 = smov [#allocation10]  }
 0x549   : > { %p2309_p1 = scmp.ne.s32.totalorder %s3438_s1, %s2308_s30  ;;  %s2312_s24 = sshll.u32 %s2454_s11, 4  ;;  %s2313_s24 = int_to_ptr.vmem [resolvable:$false] %s2312_s24 }
 0x54a   : > { %s2314_s7 = scalar_lea.vmem %s2313_s24, 256  ;;  %p2315_p3 = scmp.lt.s32.totalorder %s3438_s1, %s2313_s24 }
 0x54b   : > { %p2310_p6 = pnand %p2309_p1, %p3635_p13  ;;  %p2316_p4 = scmp.lt.s32.totalorder %s2314_s7, %s2308_s30 }
 0x54d   : > { %p2311_p10 = pneg %p2310_p6  ;;  %p2317_p7 = por %p2316_p4, %p2315_p3 }
 0x54f   : > { %p2318_p9 = pnand %p2317_p7, %p2311_p10 }
 0x551   : > { %2321 = shalt.err (!%p2318_p9)
}
 0x552   : > { %s2322_s22 = scalar_lea.hbm %s3436_s8, 128  ;;  %s2326_s26 = scalar_lea.hbm %s3637_s17, 256 }
 0x553   : > { %p2323_p11 = scmp.ne.s32.totalorder %s3436_s8, %s2322_s22  ;;  %p2327_p5 = scmp.lt.u32.totalorder %s3436_s8, %s3637_s17 }
 0x554   : > { %p2328_p8 = scmp.lt.u32.totalorder %s2326_s26, %s2322_s22  ;;  %p2330_p1 = scmp.lt.u32.totalorder %s2322_s22, %s3436_s8 }
 0x555   : > { %p2324_p0 = pnand %p2323_p11, %p3635_p13 }
 0x556   : > { %p2329_p12 = por %p2328_p8, %p2327_p5 }
 0x557   : > { %p2325_p2 = pneg %p2324_p0 }
 0x558   : > { %p2331_p6 = por %p2330_p1, %p2329_p12 }
 0x55a   : > { %p2332_p10 = pnand %p2331_p6, %p2325_p2 }
 0x55c   : > { %2335 = shalt.err (!%p2332_p10)
}
 0x55d   : > { %2069 = dma.vmem_to_hbm [thread:$0]  (%p3635_p13), %s3438_s1, 128, %s3436_s8, %s3441_s12  }
 0x55e PF: > { %s3638_s20 = sld [smem:[#allocation15_spill]]  ;;  %s3639_s27 = sld [smem:[#allocation18_spill]] }
 0x55f   : > { %p2094_p3 = scmp.ge.s32.totalorder %s2438_s15, 2 }
 0x564   : > { %s1689_s4 = sand.u32 1, %s3638_s20   ;;  %p3640_p4 = scmp.ne.s32.totalorder %s3639_s27, 0 }
 0x565   : > { %s1690_s30 = scalar_lea.sflag [#allocation4], %s1689_s4 }
 0x566   : > { %p2082_p7 = pnand %p2094_p3, %p3640_p4 }
 0x568   : > { %2389 = dma.done.wait (!%p2082_p7), %s1690_s30, 256  }
 0x569   : > { %2391 = vsyncadd (!%p2082_p7), %s1690_s30, 4294967040  ;;  %s3641_s11 = sadd.s32 4294967294, %s2438_s15  }
 0x56a   : > { %s1698_s24 = sand.u32 1, %s3641_s11  }
 0x56b   : > { %s1699_s7 = scalar_lea.sflag [#allocation9], %s1698_s24 }
 0x56c   : > { %2393 = dma.done.wait (!%p2082_p7), %s1699_s7, 4224  }
 0x56d   : > { %2395 = vsyncadd (!%p2082_p7), %s1699_s7, 4294963072  ;;  %s29_s15 = sadd.s32 1, %s2438_s15   ;;  %s3642_s11 = sld [smem:[#allocation16_spill]] }
 0x56e   : > { %p26_p13 = scmp.ge.s32.totalorder %s29_s15, 8   ;;  %s3643_s19 = sld [smem:[#allocation19_spill]] }
 0x56f   : > { %s3644_s27 = smov %s2402_s28  ;;  %s3645_s28 = smov %s2406_s29 }
 0x570   : > { %s3646_s29 = smov %s2642_s3  ;;  %s3647_s30 = smov %s2414_s9 }
 0x571   : > { %s3648_s9 = smov %s2418_s10  ;;  %s3649_s10 = smov %s2645_s2 }
 0x572   : > { %s3650_s12 = smov %s2434_s14  ;;  %s3651_s13 = smov %s3654_s21 }
 0x573   :  { %28 = sbr.rel (!%p26_p13) target bundleno = 20 (0x14), region = 137 }
 0x574   : > { %s3652_s14 = smov %s3643_s19 }
 0x57a   :  { %1713 = vsyncpa [#allocation3], 1 }
 0x57b   :  { %1715 = vsyncpa [#allocation3 + $0x1], 1 }
 0x57c   :  { %1716 = vsyncpa [#allocation6], 1 }
 0x57d   :  { %1717 = vsyncpa [#allocation4], 1 }
 0x57e   :  { %1719 = vsyncpa [#allocation4 + $0x1], 1 }
 0x57f   :  { %1720 = vsyncpa [#allocation9], 1 }
 0x580   :  { %1722 = vsyncpa [#allocation9 + $0x1], 1 }

</bundles_post_ra>
